<compile_context>
chip_gen: v6e
topology: v6e:2x2x1
jax: 0.10.0
libtpu: 0.0.40
codegen_flags: <defaults>
</compile_context>

<pallas_src>
import functools

import jax
import jax.numpy as jnp
from jax.experimental import pallas as pl
from jax.experimental.pallas import tpu as pltpu


# ----------------------------------------------------------------------------- chip flags


def _tpu_kind():
    try:
        return jax.devices()[0].device_kind.lower()
    except Exception:  # pragma: no cover
        return ""


_KIND = _tpu_kind()
# bf16 VPU/EUP path exists on v6e / v7x; v5e and older must stay f32.
_HAS_BF16_VPU = any(t in _KIND for t in ("v6", "v7", "tpu7"))
# 128 MiB VMEM chips (v5e/v6e); be conservative (64 MiB) for v7x / unknown.
_LARGE_VMEM = any(t in _KIND for t in ("v5", "v6"))

_COMPUTE_DTYPE = jnp.bfloat16 if _HAS_BF16_VPU else jnp.float32
_MAX_ROW_TILE = 256 if _LARGE_VMEM else 128
_VMEM_LIMIT = (48 if _LARGE_VMEM else 32) * 1024 * 1024


def _row_tile(n):
    """Row tile: multiple of 8, capped per generation, and >=2 grid steps when
    possible so both v7x TensorCores get work and bias-tile DMAs pipeline."""
    t = min(_MAX_ROW_TILE, n)
    if t >= n and n > 8:
        t = ((pl.cdiv(n, 2) + 7) // 8) * 8
    return max(t, 1)


# ----------------------------------------------------------------------------- kernels


def _make_transform_kernel(num_heads, fout):
    """Fused feature/score transform; emits h in the attention kernel's layout."""

    def kernel(x_ref, wcat_ref, wa_ref, h_ref, s_ref):
        # x_ref    : [TM, Fin]          bf16
        # wcat_ref : [Fin, H*Fout]      bf16  (grid-invariant)
        # wa_ref   : [Fin, 2H]          bf16  (grid-invariant, [Wa_src | Wa_dst])
        # h_ref    : [H, TM, Fout+1]    bf16  out; last column set to 1.0
        # s_ref    : [TM, 2H]           f32   out; [a_src | a_dst]
        x = x_ref[...]
        y = jnp.dot(x, wcat_ref[...], preferred_element_type=jnp.float32)
        s_ref[...] = jnp.dot(x, wa_ref[...], preferred_element_type=jnp.float32)
        ones = jnp.ones((x.shape[0], 1), jnp.bfloat16)
        for hd in range(num_heads):
            h_ref[hd, :, :fout] = y[:, hd * fout:(hd + 1) * fout].astype(jnp.bfloat16)
            h_ref[hd, :, fout:] = ones  # ones column -> MXU-computed softmax denom

    return kernel


def _make_attn_kernel(num_heads, fout, compute_dtype, negative_slope=0.2):
    """Row-tiled attention + aggregation; static head loop inside the kernel."""

    def kernel(adst_ref, asrcT_ref, bias_ref, h_ref, o_ref):
        # adst_ref : [TI, H]          f32   per-target attention score a_dst
        # asrcT_ref: [H, N]           f32   per-source attention score a_src
        # bias_ref : [TI, N]          bf16  additive adjacency bias (0 / -1e9)
        # h_ref    : [H, N, Fout+1]   bf16  transformed features (+ ones column)
        # o_ref    : [TI, H*Fout]     f32   heads packed on lanes
        cdt = compute_dtype
        adst = adst_ref[...].astype(cdt)            # tiny converts, hoisted
        asrc = asrcT_ref[...].astype(cdt)
        bias = bias_ref[...].astype(cdt)            # no-op when cdt == bf16
        for hd in range(num_heads):
            # e[i, j] = leakyrelu(a_dst[i] + a_src[j]) + adj_bias[i, j]
            e = adst[:, hd:hd + 1] + asrc[hd:hd + 1, :]          # [TI, N]
            e = jnp.maximum(e, e * negative_slope)               # mul + max
            e = e + bias
            # Masked softmax numerator: masked entries sit ~1e9 below the row
            # max so exp underflows to exactly 0 (self-loop guarantees denom>=1).
            m = jnp.max(e, axis=-1, keepdims=True)
            p = jnp.exp(e - m).astype(jnp.bfloat16)
            # One MXU pass gives both the aggregation and (via the ones column)
            # the f32-accurate softmax denominator.
            out = jnp.dot(p, h_ref[hd], preferred_element_type=jnp.float32)  # [TI, Fout+1]
            inv = pl.reciprocal(out[:, fout:fout + 1], approx=True)
            o_ref[:, hd * fout:(hd + 1) * fout] = out[:, :fout] * inv

    return kernel


# ----------------------------------------------------------------------------- layer


def gat_conv(x_bf16, adj_bias, W, att_src, att_dst, bias, *, concat):
    """One GATConv layer. x_bf16: [N, Fin] bf16; returns f32 [N, H*Fout] or [N, Fout]."""
    N, Fin = x_bf16.shape
    H, _, Fout = W.shape
    HF = H * Fout
    Fa = Fout + 1
    twoH = 2 * H

    # Fold per-head weights / attention vectors; cast weights to bf16 once here
    # so the kernels do no operand converts.
    W_cat = jnp.transpose(W, (1, 0, 2)).reshape(Fin, HF).astype(jnp.bfloat16)
    a_s = att_src.reshape(H, Fout)
    a_d = att_dst.reshape(H, Fout)
    Wa = jnp.concatenate(
        [jnp.einsum("hif,hf->ih", W, a_s),            # [Fin, H]  -> a_src scores
         jnp.einsum("hif,hf->ih", W, a_d)],           # [Fin, H]  -> a_dst scores
        axis=1).astype(jnp.bfloat16)                  # [Fin, 2H]

    TM = _row_tile(N)
    h_aug, scores = pl.pallas_call(
        _make_transform_kernel(H, Fout),
        out_shape=(jax.ShapeDtypeStruct((H, N, Fa), jnp.bfloat16),
                   jax.ShapeDtypeStruct((N, twoH), jnp.float32)),
        grid_spec=pltpu.PrefetchScalarGridSpec(
            num_scalar_prefetch=0,
            grid=(pl.cdiv(N, TM),),
            in_specs=[
                pl.BlockSpec((TM, Fin), lambda i: (i, 0)),     # x row tile (bf16)
                pl.BlockSpec((Fin, HF), lambda i: (0, 0)),     # W_cat (resident)
                pl.BlockSpec((Fin, twoH), lambda i: (0, 0)),   # Wa (resident)
            ],
            out_specs=[
                pl.BlockSpec((H, TM, Fa), lambda i: (0, i, 0)),  # h head-major bf16
                pl.BlockSpec((TM, twoH), lambda i: (i, 0)),      # scores f32
            ],
        ),
        compiler_params=pltpu.CompilerParams(
            dimension_semantics=("parallel",),
            vmem_limit_bytes=_VMEM_LIMIT,
        ),
    )(x_bf16, W_cat, Wa)

    # Tiny [N, H] glue (negligible next to the [N, N] adjacency stream).
    a_srcT = scores[:, :H].T                                   # [H, N]
    a_dst = scores[:, H:]                                      # [N, H]

    TI = _row_tile(N)
    out_flat = pl.pallas_call(
        _make_attn_kernel(H, Fout, _COMPUTE_DTYPE),
        out_shape=jax.ShapeDtypeStruct((N, HF), jnp.float32),
        grid_spec=pltpu.PrefetchScalarGridSpec(
            num_scalar_prefetch=0,
            grid=(pl.cdiv(N, TI),),
            # NOTE: the resident blocks below (a_srcT, h) have constant index
            # maps; VMEM is not the binding resource at these sizes so default
            # buffering is left untouched.
            in_specs=[
                pl.BlockSpec((TI, H), lambda i: (i, 0)),          # a_dst (row tile)
                pl.BlockSpec((H, N), lambda i: (0, 0)),           # a_src^T (resident)
                pl.BlockSpec((TI, N), lambda i: (i, 0)),          # adj bias (row tile)
                pl.BlockSpec((H, N, Fa), lambda i: (0, 0, 0)),    # h (resident, bf16)
            ],
            out_specs=pl.BlockSpec((TI, HF), lambda i: (i, 0)),   # lane-packed output
        ),
        compiler_params=pltpu.CompilerParams(
            dimension_semantics=("parallel",),
            vmem_limit_bytes=_VMEM_LIMIT,
        ),
    )(a_dst, a_srcT, adj_bias, h_aug)

    if concat:
        out = out_flat                                            # heads already packed
    else:
        out = jnp.mean(out_flat.reshape(N, H, Fout), axis=1)
    return out + bias


# ----------------------------------------------------------------------------- model


def init_gat_params(key, num_layers, in_feats, num_hidden, num_classes, heads):
    """Deterministic glorot-style init matching PyG GATConv parameter shapes."""
    dims_in = [in_feats] + [num_hidden * heads[l] for l in range(num_layers - 1)]
    dims_out = [num_hidden] * (num_layers - 1) + [num_classes]
    concat_flags = tuple([True] * (num_layers - 1) + [False])

    params = []
    for l in range(num_layers):
        H, Fin, Fout = heads[l], dims_in[l], dims_out[l]
        key, k_w, k_s, k_d = jax.random.split(key, 4)
        scale_w = (2.0 / (Fin + Fout)) ** 0.5
        W = scale_w * jax.random.normal(k_w, (H, Fin, Fout), jnp.float32)
        scale_a = (2.0 / (1 + Fout)) ** 0.5
        a_src = scale_a * jax.random.normal(k_s, (H, 1, Fout), jnp.float32)
        a_dst = scale_a * jax.random.normal(k_d, (H, 1, Fout), jnp.float32)
        bias = jnp.zeros((H * Fout,) if concat_flags[l] else (Fout,), jnp.float32)
        params.append(dict(W=W, att_src=a_src, att_dst=a_dst, bias=bias))
    return params, concat_flags


@functools.partial(jax.jit, static_argnames=("concat_flags",))
def gat_forward(x, adj_bias, params, concat_flags):
    num_layers = len(concat_flags)
    h = x.astype(jnp.bfloat16)
    out = None
    for l in range(num_layers):
        p = params[l]
        out = gat_conv(h, adj_bias, p["W"], p["att_src"], p["att_dst"], p["bias"],
                       concat=concat_flags[l])
        if l != num_layers - 1:
            out = jax.nn.elu(out)          # self.activation = F.elu
            h = out.astype(jnp.bfloat16)
    return out
    # TODO(synk): dropout is 0.0 in the reference config, so it is omitted.


# ----------------------------------------------------------------------------- reference


def gat_reference(x, adj, params, concat_flags):
    """Pure-JAX f32 reference of the same GAT forward (for a tolerance check)."""
    num_layers = len(concat_flags)
    mask = adj > 0
    for l in range(num_layers):
        p = params[l]
        W, a_s, a_d, b = p["W"], p["att_src"], p["att_dst"], p["bias"]
        H, Fin, Fout = W.shape
        N = x.shape[0]
        h = jnp.einsum("ni,hif->hnf", x, W)                       # [H, N, Fout]
        asrc = jnp.sum(h * a_s, axis=-1)                          # [H, N]
        adst = jnp.sum(h * a_d, axis=-1)                          # [H, N]
        e = adst[:, :, None] + asrc[:, None, :]                   # [H, N, N]
        e = jnp.where(e > 0, e, 0.2 * e)
        e = jnp.where(mask[None], e, -1e30)
        att = jax.nn.softmax(e, axis=-1)
        att = jnp.where(mask[None], att, 0.0)
        out_h = jnp.einsum("hij,hjf->hif", att, h)                # [H, N, Fout]
        if concat_flags[l]:
            x = jnp.transpose(out_h, (1, 0, 2)).reshape(N, H * Fout)
        else:
            x = jnp.mean(out_h, axis=0)
        x = x + b
        if l != num_layers - 1:
            x = jax.nn.elu(x)
    return x


# ----------------------------------------------------------------------------- demo


if __name__ == "__main__":
    # Small synthetic citation-like graph.
    N = 128            # nodes
    in_feats = 64
    num_hidden = 32
    num_classes = 8
    num_layers = 2
    heads = [4, 1]     # last layer: concat=False (mean over heads)

    key = jax.random.PRNGKey(0)
    key, kx, ka, kp = jax.random.split(key, 4)

    x = jax.random.normal(kx, (N, in_feats), jnp.float32)

    # Random sparse-ish adjacency, symmetrized, with self-loops (PyG default).
    adj = (jax.random.uniform(ka, (N, N)) < 0.05).astype(jnp.float32)
    adj = jnp.maximum(adj, adj.T)
    adj = jnp.maximum(adj, jnp.eye(N, dtype=jnp.float32))

    # Additive-bias form of the adjacency in bf16 (0 = edge, -1e9 = no edge):
    # hoists the mask compare out of the kernel and halves adjacency DMA bytes.
    # (On v5e an int8 mask expanded in-kernel would shrink this stream further.)
    adj_bias = jnp.where(adj > 0, 0.0, -1e9).astype(jnp.bfloat16)

    params, concat_flags = init_gat_params(
        kp, num_layers, in_feats, num_hidden, num_classes, heads)

    out = gat_forward(x, adj_bias, params, concat_flags)
    out = jax.block_until_ready(out)
    assert out.shape == (N, num_classes), out.shape
    assert bool(jnp.all(jnp.isfinite(out)))

    # Tolerance-asserted pure-JAX reference (bf16 operands => ~1-3% rel err).
    ref = gat_reference(x, adj, params, concat_flags)
    rel_err = float(jnp.linalg.norm(out - ref) / (jnp.linalg.norm(ref) + 1e-6))
    assert rel_err < 0.1, rel_err

    print("KERNEL_OK")
</pallas_src>

<mosaic_0001>
module attributes {stable_mosaic.version = 11 : i64} {
  func.func @kernel(%arg0: i32, %arg1: memref<64x64xbf16, #tpu.memory_space<vmem>>, %arg2: memref<64x128xbf16, #tpu.memory_space<vmem>>, %arg3: memref<64x8xbf16, #tpu.memory_space<vmem>>, %arg4: memref<4x64x33xbf16, #tpu.memory_space<vmem>>, %arg5: memref<64x8xf32, #tpu.memory_space<vmem>>) attributes {dimension_semantics = [#tpu.dimension_semantics<parallel>], iteration_bounds = array<i64: 2>, scalar_prefetch = 0 : i64, scratch_operands = 0 : i64, tpu.core_type = #tpu.core_type<tc>, window_params = [{transform_indices = @transform_0, window_bounds = array<i64: 64, 64>}, {pipeline_mode = #tpu.pipeline_mode<synchronous>, transform_indices = @transform_1, window_bounds = array<i64: 64, 128>}, {pipeline_mode = #tpu.pipeline_mode<synchronous>, transform_indices = @transform_2, window_bounds = array<i64: 64, 8>}, {transform_indices = @transform_3, window_bounds = array<i64: 4, 64, 33>}, {transform_indices = @transform_4, window_bounds = array<i64: 64, 8>}]} {
    %c0 = arith.constant 0 : index
    %c0_0 = arith.constant 0 : index
    %0 = vector.load %arg1[%c0, %c0_0] : memref<64x64xbf16, #tpu.memory_space<vmem>>, vector<64x64xbf16>
    %c0_1 = arith.constant 0 : index
    %c0_2 = arith.constant 0 : index
    %1 = vector.load %arg2[%c0_1, %c0_2] : memref<64x128xbf16, #tpu.memory_space<vmem>>, vector<64x128xbf16>
    %cst = arith.constant dense<0.000000e+00> : vector<64x128xf32>
    %2 = tpu.matmul %0, %1, %cst {dimension_numbers = #tpu.dot_dimension_numbers<[1], [0], [0], [1], [0, 0, 1, 1], [], []>} : vector<64x64xbf16>, vector<64x128xbf16>, vector<64x128xf32> -> vector<64x128xf32>
    %c0_3 = arith.constant 0 : index
    %c0_4 = arith.constant 0 : index
    %3 = vector.load %arg3[%c0_3, %c0_4] : memref<64x8xbf16, #tpu.memory_space<vmem>>, vector<64x8xbf16>
    %cst_5 = arith.constant dense<0.000000e+00> : vector<64x8xf32>
    %4 = tpu.matmul %0, %3, %cst_5 {dimension_numbers = #tpu.dot_dimension_numbers<[1], [0], [0], [1], [0, 0, 1, 1], [], []>} : vector<64x64xbf16>, vector<64x8xbf16>, vector<64x8xf32> -> vector<64x8xf32>
    %c0_6 = arith.constant 0 : index
    %c0_7 = arith.constant 0 : index
    %5 = vector.load %arg5[%c0_6, %c0_7] : memref<64x8xf32, #tpu.memory_space<vmem>>, vector<64x8xf32>
    tpu.vector_store %arg5[%c0_6, %c0_7], %4 {strides = array<i32>} : memref<64x8xf32, #tpu.memory_space<vmem>>, vector<64x8xf32>,
    %cst_8 = arith.constant 1.000000e+00 : bf16
    %6 = vector.broadcast %cst_8 : bf16 to vector<64x1xbf16>
    %7 = vector.extract_strided_slice %2 {offsets = [0, 0], sizes = [64, 32], strides = [1, 1]} : vector<64x128xf32> to vector<64x32xf32>
    %8 = arith.truncf %7 : vector<64x32xf32> to vector<64x32xbf16>
    %c0_9 = arith.constant 0 : index
    %c0_10 = arith.constant 0 : index
    %c0_11 = arith.constant 0 : index
    %9 = vector.load %arg4[%c0_9, %c0_10, %c0_11] : memref<4x64x33xbf16, #tpu.memory_space<vmem>>, vector<1x64x32xbf16>
    %10 = vector.shape_cast %9 : vector<1x64x32xbf16> to vector<64x32xbf16>
    %11 = vector.shape_cast %8 : vector<64x32xbf16> to vector<1x64x32xbf16>
    tpu.vector_store %arg4[%c0_9, %c0_10, %c0_11], %11 {strides = array<i32>} : memref<4x64x33xbf16, #tpu.memory_space<vmem>>, vector<1x64x32xbf16>,
    %c0_12 = arith.constant 0 : index
    %c0_13 = arith.constant 0 : index
    %c32 = arith.constant 32 : index
    %12 = vector.load %arg4[%c0_12, %c0_13, %c32] : memref<4x64x33xbf16, #tpu.memory_space<vmem>>, vector<1x64x1xbf16>
    %13 = vector.shape_cast %12 : vector<1x64x1xbf16> to vector<64x1xbf16>
    %14 = vector.shape_cast %6 : vector<64x1xbf16> to vector<1x64x1xbf16>
    tpu.vector_store %arg4[%c0_12, %c0_13, %c32], %14 {strides = array<i32>} : memref<4x64x33xbf16, #tpu.memory_space<vmem>>, vector<1x64x1xbf16>,
    %15 = vector.extract_strided_slice %2 {offsets = [0, 32], sizes = [64, 32], strides = [1, 1]} : vector<64x128xf32> to vector<64x32xf32>
    %16 = arith.truncf %15 : vector<64x32xf32> to vector<64x32xbf16>
    %c1 = arith.constant 1 : index
    %c0_14 = arith.constant 0 : index
    %c0_15 = arith.constant 0 : index
    %17 = vector.load %arg4[%c1, %c0_14, %c0_15] : memref<4x64x33xbf16, #tpu.memory_space<vmem>>, vector<1x64x32xbf16>
    %18 = vector.shape_cast %17 : vector<1x64x32xbf16> to vector<64x32xbf16>
    %19 = vector.shape_cast %16 : vector<64x32xbf16> to vector<1x64x32xbf16>
    tpu.vector_store %arg4[%c1, %c0_14, %c0_15], %19 {strides = array<i32>} : memref<4x64x33xbf16, #tpu.memory_space<vmem>>, vector<1x64x32xbf16>,
    %c1_16 = arith.constant 1 : index
    %c0_17 = arith.constant 0 : index
    %c32_18 = arith.constant 32 : index
    %20 = vector.load %arg4[%c1_16, %c0_17, %c32_18] : memref<4x64x33xbf16, #tpu.memory_space<vmem>>, vector<1x64x1xbf16>
    %21 = vector.shape_cast %20 : vector<1x64x1xbf16> to vector<64x1xbf16>
    %22 = vector.shape_cast %6 : vector<64x1xbf16> to vector<1x64x1xbf16>
    tpu.vector_store %arg4[%c1_16, %c0_17, %c32_18], %22 {strides = array<i32>} : memref<4x64x33xbf16, #tpu.memory_space<vmem>>, vector<1x64x1xbf16>,
    %23 = vector.extract_strided_slice %2 {offsets = [0, 64], sizes = [64, 32], strides = [1, 1]} : vector<64x128xf32> to vector<64x32xf32>
    %24 = arith.truncf %23 : vector<64x32xf32> to vector<64x32xbf16>
    %c2 = arith.constant 2 : index
    %c0_19 = arith.constant 0 : index
    %c0_20 = arith.constant 0 : index
    %25 = vector.load %arg4[%c2, %c0_19, %c0_20] : memref<4x64x33xbf16, #tpu.memory_space<vmem>>, vector<1x64x32xbf16>
    %26 = vector.shape_cast %25 : vector<1x64x32xbf16> to vector<64x32xbf16>
    %27 = vector.shape_cast %24 : vector<64x32xbf16> to vector<1x64x32xbf16>
    tpu.vector_store %arg4[%c2, %c0_19, %c0_20], %27 {strides = array<i32>} : memref<4x64x33xbf16, #tpu.memory_space<vmem>>, vector<1x64x32xbf16>,
    %c2_21 = arith.constant 2 : index
    %c0_22 = arith.constant 0 : index
    %c32_23 = arith.constant 32 : index
    %28 = vector.load %arg4[%c2_21, %c0_22, %c32_23] : memref<4x64x33xbf16, #tpu.memory_space<vmem>>, vector<1x64x1xbf16>
    %29 = vector.shape_cast %28 : vector<1x64x1xbf16> to vector<64x1xbf16>
    %30 = vector.shape_cast %6 : vector<64x1xbf16> to vector<1x64x1xbf16>
    tpu.vector_store %arg4[%c2_21, %c0_22, %c32_23], %30 {strides = array<i32>} : memref<4x64x33xbf16, #tpu.memory_space<vmem>>, vector<1x64x1xbf16>,
    %31 = vector.extract_strided_slice %2 {offsets = [0, 96], sizes = [64, 32], strides = [1, 1]} : vector<64x128xf32> to vector<64x32xf32>
    %32 = arith.truncf %31 : vector<64x32xf32> to vector<64x32xbf16>
    %c3 = arith.constant 3 : index
    %c0_24 = arith.constant 0 : index
    %c0_25 = arith.constant 0 : index
    %33 = vector.load %arg4[%c3, %c0_24, %c0_25] : memref<4x64x33xbf16, #tpu.memory_space<vmem>>, vector<1x64x32xbf16>
    %34 = vector.shape_cast %33 : vector<1x64x32xbf16> to vector<64x32xbf16>
    %35 = vector.shape_cast %32 : vector<64x32xbf16> to vector<1x64x32xbf16>
    tpu.vector_store %arg4[%c3, %c0_24, %c0_25], %35 {strides = array<i32>} : memref<4x64x33xbf16, #tpu.memory_space<vmem>>, vector<1x64x32xbf16>,
    %c3_26 = arith.constant 3 : index
    %c0_27 = arith.constant 0 : index
    %c32_28 = arith.constant 32 : index
    %36 = vector.load %arg4[%c3_26, %c0_27, %c32_28] : memref<4x64x33xbf16, #tpu.memory_space<vmem>>, vector<1x64x1xbf16>
    %37 = vector.shape_cast %36 : vector<1x64x1xbf16> to vector<64x1xbf16>
    %38 = vector.shape_cast %6 : vector<64x1xbf16> to vector<1x64x1xbf16>
    tpu.vector_store %arg4[%c3_26, %c0_27, %c32_28], %38 {strides = array<i32>} : memref<4x64x33xbf16, #tpu.memory_space<vmem>>, vector<1x64x1xbf16>,
    return
  }
  func.func @transform_0(%arg0: i32) -> (i32, i32) {
    %c0_i32 = arith.constant 0 : i32
    %c0_i32_0 = arith.constant 0 : i32
    return %arg0, %c0_i32 : i32, i32
  }
  func.func @transform_1(%arg0: i32) -> (i32, i32) {
    %c0_i32 = arith.constant 0 : i32
    %c0_i32_0 = arith.constant 0 : i32
    %c0_i32_1 = arith.constant 0 : i32
    return %c0_i32, %c0_i32_0 : i32, i32
  }
  func.func @transform_2(%arg0: i32) -> (i32, i32) {
    %c0_i32 = arith.constant 0 : i32
    %c0_i32_0 = arith.constant 0 : i32
    %c0_i32_1 = arith.constant 0 : i32
    return %c0_i32, %c0_i32_0 : i32, i32
  }
  func.func @transform_3(%arg0: i32) -> (i32, i32, i32) {
    %c0_i32 = arith.constant 0 : i32
    %c0_i32_0 = arith.constant 0 : i32
    %c0_i32_1 = arith.constant 0 : i32
    return %c0_i32, %arg0, %c0_i32_0 : i32, i32, i32
  }
  func.func @transform_4(%arg0: i32) -> (i32, i32) {
    %c0_i32 = arith.constant 0 : i32
    %c0_i32_0 = arith.constant 0 : i32
    return %arg0, %c0_i32 : i32, i32
  }
}

module attributes {stable_mosaic.version = 11 : i64} {
  func.func @kernel(%arg0: i32, %arg1: memref<64x4xf32, #tpu.memory_space<vmem>>, %arg2: memref<4x128xf32, #tpu.memory_space<vmem>>, %arg3: memref<64x128xbf16, #tpu.memory_space<vmem>>, %arg4: memref<4x128x33xbf16, #tpu.memory_space<vmem>>, %arg5: memref<64x128xf32, #tpu.memory_space<vmem>>) attributes {dimension_semantics = [#tpu.dimension_semantics<parallel>], iteration_bounds = array<i64: 2>, scalar_prefetch = 0 : i64, scratch_operands = 0 : i64, tpu.core_type = #tpu.core_type<tc>, window_params = [{transform_indices = @transform_0, window_bounds = array<i64: 64, 4>}, {pipeline_mode = #tpu.pipeline_mode<synchronous>, transform_indices = @transform_1, window_bounds = array<i64: 4, 128>}, {transform_indices = @transform_2, window_bounds = array<i64: 64, 128>}, {pipeline_mode = #tpu.pipeline_mode<synchronous>, transform_indices = @transform_3, window_bounds = array<i64: 4, 128, 33>}, {transform_indices = @transform_4, window_bounds = array<i64: 64, 128>}]} {
    %c0 = arith.constant 0 : index
    %c0_0 = arith.constant 0 : index
    %0 = vector.load %arg1[%c0, %c0_0] : memref<64x4xf32, #tpu.memory_space<vmem>>, vector<64x4xf32>
    %c0_1 = arith.constant 0 : index
    %c0_2 = arith.constant 0 : index
    %1 = vector.load %arg2[%c0_1, %c0_2] : memref<4x128xf32, #tpu.memory_space<vmem>>, vector<4x128xf32>
    %c0_3 = arith.constant 0 : index
    %c0_4 = arith.constant 0 : index
    %2 = vector.load %arg3[%c0_3, %c0_4] : memref<64x128xbf16, #tpu.memory_space<vmem>>, vector<64x128xbf16>
    %3 = arith.extf %2 : vector<64x128xbf16> to vector<64x128xf32>
    %4 = vector.extract_strided_slice %0 {offsets = [0, 0], sizes = [64, 1], strides = [1, 1]} : vector<64x4xf32> to vector<64x1xf32>
    %5 = vector.extract_strided_slice %1 {offsets = [0, 0], sizes = [1, 128], strides = [1, 1]} : vector<4x128xf32> to vector<1x128xf32>
    %6 = vector.broadcast %4 : vector<64x1xf32> to vector<64x128xf32>
    %7 = vector.broadcast %5 : vector<1x128xf32> to vector<64x128xf32>
    %8 = arith.addf %6, %7 : vector<64x128xf32>
    %cst = arith.constant 2.000000e-01 : f32
    %9 = vector.broadcast %cst : f32 to vector<64x128xf32>
    %10 = arith.mulf %8, %9 : vector<64x128xf32>
    %11 = arith.maximumf %8, %10 : vector<64x128xf32>
    %12 = arith.addf %11, %3 : vector<64x128xf32>
    %cst_5 = arith.constant dense<0xFF800000> : vector<64xf32>
    %13 = vector.multi_reduction <maximumf>, %12, %cst_5 [1] : vector<64x128xf32> to vector<64xf32>
    %14 = vector.shape_cast %13 : vector<64xf32> to vector<64x1xf32>
    %15 = vector.broadcast %14 : vector<64x1xf32> to vector<64x128xf32>
    %16 = arith.subf %12, %15 : vector<64x128xf32>
    %17 = math.exp %16 : vector<64x128xf32>
    %18 = arith.truncf %17 : vector<64x128xf32> to vector<64x128xbf16>
    %c0_6 = arith.constant 0 : index
    %c0_7 = arith.constant 0 : index
    %c0_8 = arith.constant 0 : index
    %19 = vector.load %arg4[%c0_6, %c0_7, %c0_8] : memref<4x128x33xbf16, #tpu.memory_space<vmem>>, vector<1x128x33xbf16>
    %20 = vector.shape_cast %19 : vector<1x128x33xbf16> to vector<128x33xbf16>
    %cst_9 = arith.constant dense<0.000000e+00> : vector<64x33xf32>
    %21 = tpu.matmul %18, %20, %cst_9 {dimension_numbers = #tpu.dot_dimension_numbers<[1], [0], [0], [1], [0, 0, 1, 1], [], []>} : vector<64x128xbf16>, vector<128x33xbf16>, vector<64x33xf32> -> vector<64x33xf32>
    %22 = vector.extract_strided_slice %21 {offsets = [0, 32], sizes = [64, 1], strides = [1, 1]} : vector<64x33xf32> to vector<64x1xf32>
    %23 = tpu.reciprocal %22 {approx = true} : vector<64x1xf32> -> vector<64x1xf32>
    %24 = vector.extract_strided_slice %21 {offsets = [0, 0], sizes = [64, 32], strides = [1, 1]} : vector<64x33xf32> to vector<64x32xf32>
    %25 = vector.broadcast %23 : vector<64x1xf32> to vector<64x32xf32>
    %26 = arith.mulf %24, %25 : vector<64x32xf32>
    %c0_10 = arith.constant 0 : index
    %c0_11 = arith.constant 0 : index
    %27 = vector.load %arg5[%c0_10, %c0_11] : memref<64x128xf32, #tpu.memory_space<vmem>>, vector<64x32xf32>
    tpu.vector_store %arg5[%c0_10, %c0_11], %26 {strides = array<i32>} : memref<64x128xf32, #tpu.memory_space<vmem>>, vector<64x32xf32>,
    %28 = vector.extract_strided_slice %0 {offsets = [0, 1], sizes = [64, 1], strides = [1, 1]} : vector<64x4xf32> to vector<64x1xf32>
    %29 = vector.extract_strided_slice %1 {offsets = [1, 0], sizes = [1, 128], strides = [1, 1]} : vector<4x128xf32> to vector<1x128xf32>
    %30 = vector.broadcast %28 : vector<64x1xf32> to vector<64x128xf32>
    %31 = vector.broadcast %29 : vector<1x128xf32> to vector<64x128xf32>
    %32 = arith.addf %30, %31 : vector<64x128xf32>
    %cst_12 = arith.constant 2.000000e-01 : f32
    %33 = vector.broadcast %cst_12 : f32 to vector<64x128xf32>
    %34 = arith.mulf %32, %33 : vector<64x128xf32>
    %35 = arith.maximumf %32, %34 : vector<64x128xf32>
    %36 = arith.addf %35, %3 : vector<64x128xf32>
    %cst_13 = arith.constant dense<0xFF800000> : vector<64xf32>
    %37 = vector.multi_reduction <maximumf>, %36, %cst_13 [1] : vector<64x128xf32> to vector<64xf32>
    %38 = vector.shape_cast %37 : vector<64xf32> to vector<64x1xf32>
    %39 = vector.broadcast %38 : vector<64x1xf32> to vector<64x128xf32>
    %40 = arith.subf %36, %39 : vector<64x128xf32>
    %41 = math.exp %40 : vector<64x128xf32>
    %42 = arith.truncf %41 : vector<64x128xf32> to vector<64x128xbf16>
    %c1 = arith.constant 1 : index
    %c0_14 = arith.constant 0 : index
    %c0_15 = arith.constant 0 : index
    %43 = vector.load %arg4[%c1, %c0_14, %c0_15] : memref<4x128x33xbf16, #tpu.memory_space<vmem>>, vector<1x128x33xbf16>
    %44 = vector.shape_cast %43 : vector<1x128x33xbf16> to vector<128x33xbf16>
    %cst_16 = arith.constant dense<0.000000e+00> : vector<64x33xf32>
    %45 = tpu.matmul %42, %44, %cst_16 {dimension_numbers = #tpu.dot_dimension_numbers<[1], [0], [0], [1], [0, 0, 1, 1], [], []>} : vector<64x128xbf16>, vector<128x33xbf16>, vector<64x33xf32> -> vector<64x33xf32>
    %46 = vector.extract_strided_slice %45 {offsets = [0, 32], sizes = [64, 1], strides = [1, 1]} : vector<64x33xf32> to vector<64x1xf32>
    %47 = tpu.reciprocal %46 {approx = true} : vector<64x1xf32> -> vector<64x1xf32>
    %48 = vector.extract_strided_slice %45 {offsets = [0, 0], sizes = [64, 32], strides = [1, 1]} : vector<64x33xf32> to vector<64x32xf32>
    %49 = vector.broadcast %47 : vector<64x1xf32> to vector<64x32xf32>
    %50 = arith.mulf %48, %49 : vector<64x32xf32>
    %c0_17 = arith.constant 0 : index
    %c32 = arith.constant 32 : index
    %51 = vector.load %arg5[%c0_17, %c32] : memref<64x128xf32, #tpu.memory_space<vmem>>, vector<64x32xf32>
    tpu.vector_store %arg5[%c0_17, %c32], %50 {strides = array<i32>} : memref<64x128xf32, #tpu.memory_space<vmem>>, vector<64x32xf32>,
    %52 = vector.extract_strided_slice %0 {offsets = [0, 2], sizes = [64, 1], strides = [1, 1]} : vector<64x4xf32> to vector<64x1xf32>
    %53 = vector.extract_strided_slice %1 {offsets = [2, 0], sizes = [1, 128], strides = [1, 1]} : vector<4x128xf32> to vector<1x128xf32>
    %54 = vector.broadcast %52 : vector<64x1xf32> to vector<64x128xf32>
    %55 = vector.broadcast %53 : vector<1x128xf32> to vector<64x128xf32>
    %56 = arith.addf %54, %55 : vector<64x128xf32>
    %cst_18 = arith.constant 2.000000e-01 : f32
    %57 = vector.broadcast %cst_18 : f32 to vector<64x128xf32>
    %58 = arith.mulf %56, %57 : vector<64x128xf32>
    %59 = arith.maximumf %56, %58 : vector<64x128xf32>
    %60 = arith.addf %59, %3 : vector<64x128xf32>
    %cst_19 = arith.constant dense<0xFF800000> : vector<64xf32>
    %61 = vector.multi_reduction <maximumf>, %60, %cst_19 [1] : vector<64x128xf32> to vector<64xf32>
    %62 = vector.shape_cast %61 : vector<64xf32> to vector<64x1xf32>
    %63 = vector.broadcast %62 : vector<64x1xf32> to vector<64x128xf32>
    %64 = arith.subf %60, %63 : vector<64x128xf32>
    %65 = math.exp %64 : vector<64x128xf32>
    %66 = arith.truncf %65 : vector<64x128xf32> to vector<64x128xbf16>
    %c2 = arith.constant 2 : index
    %c0_20 = arith.constant 0 : index
    %c0_21 = arith.constant 0 : index
    %67 = vector.load %arg4[%c2, %c0_20, %c0_21] : memref<4x128x33xbf16, #tpu.memory_space<vmem>>, vector<1x128x33xbf16>
    %68 = vector.shape_cast %67 : vector<1x128x33xbf16> to vector<128x33xbf16>
    %cst_22 = arith.constant dense<0.000000e+00> : vector<64x33xf32>
    %69 = tpu.matmul %66, %68, %cst_22 {dimension_numbers = #tpu.dot_dimension_numbers<[1], [0], [0], [1], [0, 0, 1, 1], [], []>} : vector<64x128xbf16>, vector<128x33xbf16>, vector<64x33xf32> -> vector<64x33xf32>
    %70 = vector.extract_strided_slice %69 {offsets = [0, 32], sizes = [64, 1], strides = [1, 1]} : vector<64x33xf32> to vector<64x1xf32>
    %71 = tpu.reciprocal %70 {approx = true} : vector<64x1xf32> -> vector<64x1xf32>
    %72 = vector.extract_strided_slice %69 {offsets = [0, 0], sizes = [64, 32], strides = [1, 1]} : vector<64x33xf32> to vector<64x32xf32>
    %73 = vector.broadcast %71 : vector<64x1xf32> to vector<64x32xf32>
    %74 = arith.mulf %72, %73 : vector<64x32xf32>
    %c0_23 = arith.constant 0 : index
    %c64 = arith.constant 64 : index
    %75 = vector.load %arg5[%c0_23, %c64] : memref<64x128xf32, #tpu.memory_space<vmem>>, vector<64x32xf32>
    tpu.vector_store %arg5[%c0_23, %c64], %74 {strides = array<i32>} : memref<64x128xf32, #tpu.memory_space<vmem>>, vector<64x32xf32>,
    %76 = vector.extract_strided_slice %0 {offsets = [0, 3], sizes = [64, 1], strides = [1, 1]} : vector<64x4xf32> to vector<64x1xf32>
    %77 = vector.extract_strided_slice %1 {offsets = [3, 0], sizes = [1, 128], strides = [1, 1]} : vector<4x128xf32> to vector<1x128xf32>
    %78 = vector.broadcast %76 : vector<64x1xf32> to vector<64x128xf32>
    %79 = vector.broadcast %77 : vector<1x128xf32> to vector<64x128xf32>
    %80 = arith.addf %78, %79 : vector<64x128xf32>
    %cst_24 = arith.constant 2.000000e-01 : f32
    %81 = vector.broadcast %cst_24 : f32 to vector<64x128xf32>
    %82 = arith.mulf %80, %81 : vector<64x128xf32>
    %83 = arith.maximumf %80, %82 : vector<64x128xf32>
    %84 = arith.addf %83, %3 : vector<64x128xf32>
    %cst_25 = arith.constant dense<0xFF800000> : vector<64xf32>
    %85 = vector.multi_reduction <maximumf>, %84, %cst_25 [1] : vector<64x128xf32> to vector<64xf32>
    %86 = vector.shape_cast %85 : vector<64xf32> to vector<64x1xf32>
    %87 = vector.broadcast %86 : vector<64x1xf32> to vector<64x128xf32>
    %88 = arith.subf %84, %87 : vector<64x128xf32>
    %89 = math.exp %88 : vector<64x128xf32>
    %90 = arith.truncf %89 : vector<64x128xf32> to vector<64x128xbf16>
    %c3 = arith.constant 3 : index
    %c0_26 = arith.constant 0 : index
    %c0_27 = arith.constant 0 : index
    %91 = vector.load %arg4[%c3, %c0_26, %c0_27] : memref<4x128x33xbf16, #tpu.memory_space<vmem>>, vector<1x128x33xbf16>
    %92 = vector.shape_cast %91 : vector<1x128x33xbf16> to vector<128x33xbf16>
    %cst_28 = arith.constant dense<0.000000e+00> : vector<64x33xf32>
    %93 = tpu.matmul %90, %92, %cst_28 {dimension_numbers = #tpu.dot_dimension_numbers<[1], [0], [0], [1], [0, 0, 1, 1], [], []>} : vector<64x128xbf16>, vector<128x33xbf16>, vector<64x33xf32> -> vector<64x33xf32>
    %94 = vector.extract_strided_slice %93 {offsets = [0, 32], sizes = [64, 1], strides = [1, 1]} : vector<64x33xf32> to vector<64x1xf32>
    %95 = tpu.reciprocal %94 {approx = true} : vector<64x1xf32> -> vector<64x1xf32>
    %96 = vector.extract_strided_slice %93 {offsets = [0, 0], sizes = [64, 32], strides = [1, 1]} : vector<64x33xf32> to vector<64x32xf32>
    %97 = vector.broadcast %95 : vector<64x1xf32> to vector<64x32xf32>
    %98 = arith.mulf %96, %97 : vector<64x32xf32>
    %c0_29 = arith.constant 0 : index
    %c96 = arith.constant 96 : index
    %99 = vector.load %arg5[%c0_29, %c96] : memref<64x128xf32, #tpu.memory_space<vmem>>, vector<64x32xf32>
    tpu.vector_store %arg5[%c0_29, %c96], %98 {strides = array<i32>} : memref<64x128xf32, #tpu.memory_space<vmem>>, vector<64x32xf32>,
    return
  }
  func.func @transform_0(%arg0: i32) -> (i32, i32) {
    %c0_i32 = arith.constant 0 : i32
    %c0_i32_0 = arith.constant 0 : i32
    return %arg0, %c0_i32 : i32, i32
  }
  func.func @transform_1(%arg0: i32) -> (i32, i32) {
    %c0_i32 = arith.constant 0 : i32
    %c0_i32_0 = arith.constant 0 : i32
    %c0_i32_1 = arith.constant 0 : i32
    return %c0_i32, %c0_i32_0 : i32, i32
  }
  func.func @transform_2(%arg0: i32) -> (i32, i32) {
    %c0_i32 = arith.constant 0 : i32
    %c0_i32_0 = arith.constant 0 : i32
    return %arg0, %c0_i32 : i32, i32
  }
  func.func @transform_3(%arg0: i32) -> (i32, i32, i32) {
    %c0_i32 = arith.constant 0 : i32
    %c0_i32_0 = arith.constant 0 : i32
    %c0_i32_1 = arith.constant 0 : i32
    %c0_i32_2 = arith.constant 0 : i32
    return %c0_i32, %c0_i32_0, %c0_i32_1 : i32, i32, i32
  }
  func.func @transform_4(%arg0: i32) -> (i32, i32) {
    %c0_i32 = arith.constant 0 : i32
    %c0_i32_0 = arith.constant 0 : i32
    return %arg0, %c0_i32 : i32, i32
  }
}

module attributes {stable_mosaic.version = 11 : i64} {
  func.func @kernel(%arg0: i32, %arg1: memref<64x128xbf16, #tpu.memory_space<vmem>>, %arg2: memref<128x8xbf16, #tpu.memory_space<vmem>>, %arg3: memref<128x2xbf16, #tpu.memory_space<vmem>>, %arg4: memref<1x64x9xbf16, #tpu.memory_space<vmem>>, %arg5: memref<64x2xf32, #tpu.memory_space<vmem>>) attributes {dimension_semantics = [#tpu.dimension_semantics<parallel>], iteration_bounds = array<i64: 2>, scalar_prefetch = 0 : i64, scratch_operands = 0 : i64, tpu.core_type = #tpu.core_type<tc>, window_params = [{transform_indices = @transform_0, window_bounds = array<i64: 64, 128>}, {pipeline_mode = #tpu.pipeline_mode<synchronous>, transform_indices = @transform_1, window_bounds = array<i64: 128, 8>}, {pipeline_mode = #tpu.pipeline_mode<synchronous>, transform_indices = @transform_2, window_bounds = array<i64: 128, 2>}, {transform_indices = @transform_3, window_bounds = array<i64: 1, 64, 9>}, {transform_indices = @transform_4, window_bounds = array<i64: 64, 2>}]} {
    %c0 = arith.constant 0 : index
    %c0_0 = arith.constant 0 : index
    %0 = vector.load %arg1[%c0, %c0_0] : memref<64x128xbf16, #tpu.memory_space<vmem>>, vector<64x128xbf16>
    %c0_1 = arith.constant 0 : index
    %c0_2 = arith.constant 0 : index
    %1 = vector.load %arg2[%c0_1, %c0_2] : memref<128x8xbf16, #tpu.memory_space<vmem>>, vector<128x8xbf16>
    %cst = arith.constant dense<0.000000e+00> : vector<64x8xf32>
    %2 = tpu.matmul %0, %1, %cst {dimension_numbers = #tpu.dot_dimension_numbers<[1], [0], [0], [1], [0, 0, 1, 1], [], []>} : vector<64x128xbf16>, vector<128x8xbf16>, vector<64x8xf32> -> vector<64x8xf32>
    %c0_3 = arith.constant 0 : index
    %c0_4 = arith.constant 0 : index
    %3 = vector.load %arg3[%c0_3, %c0_4] : memref<128x2xbf16, #tpu.memory_space<vmem>>, vector<128x2xbf16>
    %cst_5 = arith.constant dense<0.000000e+00> : vector<64x2xf32>
    %4 = tpu.matmul %0, %3, %cst_5 {dimension_numbers = #tpu.dot_dimension_numbers<[1], [0], [0], [1], [0, 0, 1, 1], [], []>} : vector<64x128xbf16>, vector<128x2xbf16>, vector<64x2xf32> -> vector<64x2xf32>
    %c0_6 = arith.constant 0 : index
    %c0_7 = arith.constant 0 : index
    %5 = vector.load %arg5[%c0_6, %c0_7] : memref<64x2xf32, #tpu.memory_space<vmem>>, vector<64x2xf32>
    tpu.vector_store %arg5[%c0_6, %c0_7], %4 {strides = array<i32>} : memref<64x2xf32, #tpu.memory_space<vmem>>, vector<64x2xf32>,
    %cst_8 = arith.constant 1.000000e+00 : bf16
    %6 = vector.broadcast %cst_8 : bf16 to vector<64x1xbf16>
    %7 = arith.truncf %2 : vector<64x8xf32> to vector<64x8xbf16>
    %c0_9 = arith.constant 0 : index
    %c0_10 = arith.constant 0 : index
    %c0_11 = arith.constant 0 : index
    %8 = vector.load %arg4[%c0_9, %c0_10, %c0_11] : memref<1x64x9xbf16, #tpu.memory_space<vmem>>, vector<1x64x8xbf16>
    %9 = vector.shape_cast %8 : vector<1x64x8xbf16> to vector<64x8xbf16>
    %10 = vector.shape_cast %7 : vector<64x8xbf16> to vector<1x64x8xbf16>
    tpu.vector_store %arg4[%c0_9, %c0_10, %c0_11], %10 {strides = array<i32>} : memref<1x64x9xbf16, #tpu.memory_space<vmem>>, vector<1x64x8xbf16>,
    %c0_12 = arith.constant 0 : index
    %c0_13 = arith.constant 0 : index
    %c8 = arith.constant 8 : index
    %11 = vector.load %arg4[%c0_12, %c0_13, %c8] : memref<1x64x9xbf16, #tpu.memory_space<vmem>>, vector<1x64x1xbf16>
    %12 = vector.shape_cast %11 : vector<1x64x1xbf16> to vector<64x1xbf16>
    %13 = vector.shape_cast %6 : vector<64x1xbf16> to vector<1x64x1xbf16>
    tpu.vector_store %arg4[%c0_12, %c0_13, %c8], %13 {strides = array<i32>} : memref<1x64x9xbf16, #tpu.memory_space<vmem>>, vector<1x64x1xbf16>,
    return
  }
  func.func @transform_0(%arg0: i32) -> (i32, i32) {
    %c0_i32 = arith.constant 0 : i32
    %c0_i32_0 = arith.constant 0 : i32
    return %arg0, %c0_i32 : i32, i32
  }
  func.func @transform_1(%arg0: i32) -> (i32, i32) {
    %c0_i32 = arith.constant 0 : i32
    %c0_i32_0 = arith.constant 0 : i32
    %c0_i32_1 = arith.constant 0 : i32
    return %c0_i32, %c0_i32_0 : i32, i32
  }
  func.func @transform_2(%arg0: i32) -> (i32, i32) {
    %c0_i32 = arith.constant 0 : i32
    %c0_i32_0 = arith.constant 0 : i32
    %c0_i32_1 = arith.constant 0 : i32
    return %c0_i32, %c0_i32_0 : i32, i32
  }
  func.func @transform_3(%arg0: i32) -> (i32, i32, i32) {
    %c0_i32 = arith.constant 0 : i32
    %c0_i32_0 = arith.constant 0 : i32
    %c0_i32_1 = arith.constant 0 : i32
    return %c0_i32, %arg0, %c0_i32_0 : i32, i32, i32
  }
  func.func @transform_4(%arg0: i32) -> (i32, i32) {
    %c0_i32 = arith.constant 0 : i32
    %c0_i32_0 = arith.constant 0 : i32
    return %arg0, %c0_i32 : i32, i32
  }
}

module attributes {stable_mosaic.version = 11 : i64} {
  func.func @kernel(%arg0: i32, %arg1: memref<64x1xf32, #tpu.memory_space<vmem>>, %arg2: memref<1x128xf32, #tpu.memory_space<vmem>>, %arg3: memref<64x128xbf16, #tpu.memory_space<vmem>>, %arg4: memref<1x128x9xbf16, #tpu.memory_space<vmem>>, %arg5: memref<64x8xf32, #tpu.memory_space<vmem>>) attributes {dimension_semantics = [#tpu.dimension_semantics<parallel>], iteration_bounds = array<i64: 2>, scalar_prefetch = 0 : i64, scratch_operands = 0 : i64, tpu.core_type = #tpu.core_type<tc>, window_params = [{transform_indices = @transform_0, window_bounds = array<i64: 64, 1>}, {pipeline_mode = #tpu.pipeline_mode<synchronous>, transform_indices = @transform_1, window_bounds = array<i64: 1, 128>}, {transform_indices = @transform_2, window_bounds = array<i64: 64, 128>}, {pipeline_mode = #tpu.pipeline_mode<synchronous>, transform_indices = @transform_3, window_bounds = array<i64: 1, 128, 9>}, {transform_indices = @transform_4, window_bounds = array<i64: 64, 8>}]} {
    %c0 = arith.constant 0 : index
    %c0_0 = arith.constant 0 : index
    %0 = vector.load %arg1[%c0, %c0_0] : memref<64x1xf32, #tpu.memory_space<vmem>>, vector<64x1xf32>
    %c0_1 = arith.constant 0 : index
    %c0_2 = arith.constant 0 : index
    %1 = vector.load %arg2[%c0_1, %c0_2] : memref<1x128xf32, #tpu.memory_space<vmem>>, vector<1x128xf32>
    %c0_3 = arith.constant 0 : index
    %c0_4 = arith.constant 0 : index
    %2 = vector.load %arg3[%c0_3, %c0_4] : memref<64x128xbf16, #tpu.memory_space<vmem>>, vector<64x128xbf16>
    %3 = arith.extf %2 : vector<64x128xbf16> to vector<64x128xf32>
    %4 = vector.broadcast %0 : vector<64x1xf32> to vector<64x128xf32>
    %5 = vector.broadcast %1 : vector<1x128xf32> to vector<64x128xf32>
    %6 = arith.addf %4, %5 : vector<64x128xf32>
    %cst = arith.constant 2.000000e-01 : f32
    %7 = vector.broadcast %cst : f32 to vector<64x128xf32>
    %8 = arith.mulf %6, %7 : vector<64x128xf32>
    %9 = arith.maximumf %6, %8 : vector<64x128xf32>
    %10 = arith.addf %9, %3 : vector<64x128xf32>
    %cst_5 = arith.constant dense<0xFF800000> : vector<64xf32>
    %11 = vector.multi_reduction <maximumf>, %10, %cst_5 [1] : vector<64x128xf32> to vector<64xf32>
    %12 = vector.shape_cast %11 : vector<64xf32> to vector<64x1xf32>
    %13 = vector.broadcast %12 : vector<64x1xf32> to vector<64x128xf32>
    %14 = arith.subf %10, %13 : vector<64x128xf32>
    %15 = math.exp %14 : vector<64x128xf32>
    %16 = arith.truncf %15 : vector<64x128xf32> to vector<64x128xbf16>
    %c0_6 = arith.constant 0 : index
    %c0_7 = arith.constant 0 : index
    %c0_8 = arith.constant 0 : index
    %17 = vector.load %arg4[%c0_6, %c0_7, %c0_8] : memref<1x128x9xbf16, #tpu.memory_space<vmem>>, vector<1x128x9xbf16>
    %18 = vector.shape_cast %17 : vector<1x128x9xbf16> to vector<128x9xbf16>
    %cst_9 = arith.constant dense<0.000000e+00> : vector<64x9xf32>
    %19 = tpu.matmul %16, %18, %cst_9 {dimension_numbers = #tpu.dot_dimension_numbers<[1], [0], [0], [1], [0, 0, 1, 1], [], []>} : vector<64x128xbf16>, vector<128x9xbf16>, vector<64x9xf32> -> vector<64x9xf32>
    %20 = vector.extract_strided_slice %19 {offsets = [0, 8], sizes = [64, 1], strides = [1, 1]} : vector<64x9xf32> to vector<64x1xf32>
    %21 = tpu.reciprocal %20 {approx = true} : vector<64x1xf32> -> vector<64x1xf32>
    %22 = vector.extract_strided_slice %19 {offsets = [0, 0], sizes = [64, 8], strides = [1, 1]} : vector<64x9xf32> to vector<64x8xf32>
    %23 = vector.broadcast %21 : vector<64x1xf32> to vector<64x8xf32>
    %24 = arith.mulf %22, %23 : vector<64x8xf32>
    %c0_10 = arith.constant 0 : index
    %c0_11 = arith.constant 0 : index
    %25 = vector.load %arg5[%c0_10, %c0_11] : memref<64x8xf32, #tpu.memory_space<vmem>>, vector<64x8xf32>
    tpu.vector_store %arg5[%c0_10, %c0_11], %24 {strides = array<i32>} : memref<64x8xf32, #tpu.memory_space<vmem>>, vector<64x8xf32>,
    return
  }
  func.func @transform_0(%arg0: i32) -> (i32, i32) {
    %c0_i32 = arith.constant 0 : i32
    %c0_i32_0 = arith.constant 0 : i32
    return %arg0, %c0_i32 : i32, i32
  }
  func.func @transform_1(%arg0: i32) -> (i32, i32) {
    %c0_i32 = arith.constant 0 : i32
    %c0_i32_0 = arith.constant 0 : i32
    %c0_i32_1 = arith.constant 0 : i32
    return %c0_i32, %c0_i32_0 : i32, i32
  }
  func.func @transform_2(%arg0: i32) -> (i32, i32) {
    %c0_i32 = arith.constant 0 : i32
    %c0_i32_0 = arith.constant 0 : i32
    return %arg0, %c0_i32 : i32, i32
  }
  func.func @transform_3(%arg0: i32) -> (i32, i32, i32) {
    %c0_i32 = arith.constant 0 : i32
    %c0_i32_0 = arith.constant 0 : i32
    %c0_i32_1 = arith.constant 0 : i32
    %c0_i32_2 = arith.constant 0 : i32
    return %c0_i32, %c0_i32_0, %c0_i32_1 : i32, i32, i32
  }
  func.func @transform_4(%arg0: i32) -> (i32, i32) {
    %c0_i32 = arith.constant 0 : i32
    %c0_i32_0 = arith.constant 0 : i32
    return %arg0, %c0_i32 : i32, i32
  }
}

</mosaic_0001>

<bundles_post_ra>
// kernel: gat_forward.4
= control target key start
LH: loop header
LB: loop body
LE: loop exit
PB: predicated region body
PF: predicated region fallthrough
CT: control target
= control target key end

     0   :  { %s1128_s15 = smov 0   ;;  %s1130_s16 = smov 0   ;;  %s1427_s0 = inlined_call_operand.vmem [shape: bf16[128,64], index: 0, kind: input, shape index: {}]   ;;  %s1428_s1 = inlined_call_operand.vmem [shape: bf16[64,128], index: 1, kind: input, shape index: {}]   ;;  %s1429_s2 = inlined_call_operand.vmem [shape: bf16[64,8], index: 2, kind: input, shape index: {}]   ;;  %s1430_s3 = inlined_call_operand.vmem [shape: bf16[4,128,33], index: 3, kind: output, shape index: {0}]   ;;  %s1431_s4 = inlined_call_operand.vmem [shape: f32[128,8], index: 4, kind: output, shape index: {1}]  }
   0x1   :  { %s1132_s17 = smov 0  }
   0x2 LB: > { %s1141_s18 = sadd.s32 4294967295, %s1097_s17   ;;  %s1143_s19 = sadd.s32 1, %s1097_s17   ;;  %s1097_s17 = sphi %s1132_s17, %s1435_s17   ;;  %s1093_s16 = sphi %s1130_s16, %s1434_s16   ;;  %s1089_s15 = sphi %s1128_s15, %s1433_s15  }
   0x3   : > { %s87_s20 = ssub.s32 %s1097_s17, %s1143_s19  ;;  %s90_s21 = sadd.s32 1, %s1093_s16 }
   0x4   : > { %p88_p0 = scmp.eq.s32.totalorder %s87_s20, 0  ;;  %p100_p1 = scmp.ne.s32.totalorder %s1093_s16, %s1089_s15 }
   0x5   : > { %p101_p2 = scmp.eq.s32.totalorder %s1141_s18, 1  ;;  %p891_p3 = scmp.ge.s32.totalorder %s1097_s17, 1 }
   0x6   : > { %s1151_s22 = scalar_select %p88_p0, %s1093_s16, %s90_s21  }
   0x7   : > { %p1153_p4 = por %p101_p2, %p100_p1  ;;  %p166_p5 = scmp.lt.s32.totalorder %s1097_s17, 3 }
   0x9   : > { %p167_p6 = pnand %p891_p3, %p166_p5 }
   0xa   : > { %s893_s26 = sshll.u32 (!%p167_p6), %s1141_s18, 3  ;;  %s186_s25 = sand.u32 (!%p167_p6), 1, %s1089_s15  }
   0xb   : > { %170 = sbr.rel (%p167_p6) target bundleno = 397 (0x18d), region = 32  ;;  %p197_p7 = scmp.lt.s32.totalorder (!%p167_p6), %s893_s26, 15 }
   0xc   : > { %s892_s27 = sshll.u32 (!%p167_p6), %s186_s25, 7  ;;  %s1099_s29 = smov (!%p167_p6), 64  }
   0xd   : > { %s1197_s28 = scalar_lea.vmem (!%p167_p6), [#allocation2], %s892_s27  ;;  %s1100_s15 = smov (!%p167_p6), 96  }
   0xe   : > { %s1102_s30 = smov (!%p167_p6), 32  }
  0x10   : > { %v1063_v0 = vld [vmem:[%s1428_s1 + $0x18] sm:$0xff]   ;;  %v1064_v1 = vld [vmem:[%s1428_s1 + $0x10] sm:$0xff]   ;;  %v1065_v2 = vld [vmem:[%s1428_s1 + $0x8] sm:$0xff]   ;;  %s1437_s26 = smov (!%p197_p7, %s893_s26), 15  ;;  %vm271_vm0 = vcmask 523264   ;;  %vm487_vm1 = vcmask 257024  }
  0x11   : > { %1003 = vmatprep.subr.bf16.mxu0 %v1063_v0  ;;  %v1071_v3 = vld [vmem:[%s1429_s2 + $0x18] sm:$0xff]   ;;  %s894_s7 = sshll.u32 %s1437_s26, 2  ;;  %v1072_v4 = vld [vmem:[%s1429_s2 + $0x10] sm:$0xff]   ;;  %v1066_v5 = vld [vmem:[%s1428_s1] sm:$0xff]   ;;  %vm496_vm2 = vcmask 265472   ;;  %s896_s5 = sshll.u32 %s1437_s26, 3 }
  0x12   : > { %1004 = vmatpush3.bf16.msra.mxu0 %v1063_v0  ;;  %s200_s14 = scalar_lea.vmem %s1427_s0, %s894_s7  ;;  %1019 = vmatprep.subr.bf16.mxu1 %v1071_v3  ;;  %v1073_v7 = vld [vmem:[%s1429_s2 + $0x8] sm:$0xff]   ;;  %v1074_v8 = vld [vmem:[%s1429_s2] sm:$0xff]   ;;  %v1101_v16 = vmov 1065369472   ;;  %vm446_vm3 = vcmask 64512   ;;  %s207_s8 = scalar_lea.vmem %s1431_s4, %s896_s5 }
  0x13   : > { %1005 = vmatprep.subr.bf16.mxu0 %v1064_v1  ;;  %v1067_v6 = vld [vmem:[%s200_s14] sm:$0xff]   ;;  %1020 = vmatpush3.bf16.msra.mxu1 %v1071_v3  ;;  %v1068_v9 = vld [vmem:[%s200_s14 + $0x8] sm:$0xff]   ;;  %v1069_v10 = vld [vmem:[%s200_s14 + $0x10] sm:$0xff]   ;;  %s986_s26 = sshll.u32 (%p1153_p4), %s1141_s18, 5 }
  0x14   : > { %1021 = vmatprep.subr.bf16.mxu1 %v1072_v4  ;;  %1011 = vmatprep.mubr.msk.bf16.mxu0 %vm271_vm0, %v1067_v6  ;;  %v1070_v11 = vld [vmem:[%s200_s14 + $0x18] sm:$0xff]   ;;  %s642_s11 = scalar_lea.vmem (%p1153_p4), %s1430_s3, %s986_s26 }
  0x15   : > { %1027 = vmatprep.mubr.msk.bf16.mxu1 %vm271_vm0, %v1067_v6 }
  0x16   : > { %1006 = vmatpush3.bf16.msra.mxu0 %v1064_v1 }
  0x17   : > { %1007 = vmatprep.subr.bf16.mxu0 %v1065_v2  ;;  %1022 = vmatpush3.bf16.msra.mxu1 %v1072_v4 }
  0x18   : > { %1023 = vmatprep.subr.bf16.mxu1 %v1073_v7 }
  0x1a   : > { %1008 = vmatpush3.bf16.msra.mxu0 %v1065_v2 }
  0x1b   : > { %1009 = vmatprep.subr.bf16.mxu0 %v1066_v5  ;;  %1024 = vmatpush3.bf16.msra.mxu1 %v1073_v7 }
  0x1c   : > { %1025 = vmatprep.subr.bf16.mxu1 %v1074_v8 }
  0x1e   : > { %1010 = vmatpush3.bf16.msra.mxu0 %v1066_v5 }
  0x1f   : > { %1026 = vmatpush3.bf16.msra.mxu1 %v1074_v8 }
  0x21   : > { %1012 = vmatmul.mubr.msk.bf16.vlgmr.msra.gmra.mxu0 %vm271_vm0, %v1068_v9 }
  0x22   : > { %1015 = vmatprep.mubr.msk.bf16.mxu0 %vm271_vm0, %v1069_v10  ;;  %1028 = vmatmul.mubr.msk.bf16.vlgmr.msra.gmra.mxu1 %vm271_vm0, %v1068_v9 }
  0x23   : > { %1031 = vmatprep.mubr.msk.bf16.mxu1 %vm271_vm0, %v1069_v10 }
  0x29   : > { %1016 = vmatmul.mubr.msk.bf16.gmra.mxu0 %vm271_vm0, %v1070_v11 }
  0x2a   : > { %1032 = vmatmul.mubr.msk.bf16.gmra.mxu1 %vm271_vm0, %v1070_v11 }
  0xe1   : > { %v1013_v12 = vpop.f32.mrf.mxu0 }
  0xe2   : > { %v980_v13 = vpack.c.bf16 %v1013_v12, %v1013_v12  ;;  %v1029_v28 = vpop.f32.mrf.mxu1 }
  0xe3   : > { %v318_v14 = vpop.f32.mrf.mxu0  ;;  %449 = vst.msk [vmem:[%s207_s8 + $0x10] sm:$0xff] %vm446_vm3, %v1029_v28 }
  0xe4   : > { %490 = vst.msk [vmem:[%s1197_s28 + $0x8] sm:$0xf] %vm487_vm1, %v980_v13  ;;  %v978_v15 = vpack.c.bf16 %v318_v14, %v318_v14  ;;  %550 = vrot.lane.b32.xlu0 %v980_v13, %s1099_s29  ;;  %509 = vrot.lane.b32.xlu1 %v980_v13, %s1100_s15  ;;  %v415_v30 = vpop.f32.mrf.mxu1 }
  0xe5   : > { %499 = vst.msk [vmem:[%s1197_s28 + $0x8] sm:$0xf] %vm496_vm2, %v1101_v16  ;;  %v1014_v17 = vpop.f32.mrf.mxu0 }
  0xe6   : > { %488 = vst.msk [vmem:[%s1197_s28] sm:$0xf] %vm487_vm1, %v978_v15  ;;  %v981_v18 = vpack.c.bf16 %v1014_v17, %v1014_v17  ;;  %v1030_v31 = vpop.f32.mrf.mxu1 }
  0xe7   : > { %497 = vst.msk [vmem:[%s1197_s28] sm:$0xf] %vm496_vm2, %v1101_v16  ;;  %v321_v19 = vpop.f32.mrf.mxu0 }
  0xe8   : > { %491 = vst.msk [vmem:[%s1197_s28 + $0xc] sm:$0xf] %vm487_vm1, %v981_v18  ;;  %v979_v20 = vpack.c.bf16 %v321_v19, %v321_v19  ;;  %591 = vrot.lane.b32.xlu0 %v980_v13, %s1102_s30  ;;  %511 = vrot.lane.b32.xlu1 %v981_v18, %s1100_s15  ;;  %v418_v32 = vpop.f32.mrf.mxu1 }
  0xe9   : > { %500 = vst.msk [vmem:[%s1197_s28 + $0xc] sm:$0xf] %vm496_vm2, %v1101_v16  ;;  %v1017_v21 = vpop.f32.mrf.mxu0 }
  0xea   : > { %489 = vst.msk [vmem:[%s1197_s28 + $0x4] sm:$0xf] %vm487_vm1, %v979_v20  ;;  %v984_v22 = vpack.c.bf16 %v1017_v21, %v1017_v21  ;;  %v1033_v33 = vpop.f32.mrf.mxu1 }
  0xeb   : > { %498 = vst.msk [vmem:[%s1197_s28 + $0x4] sm:$0xf] %vm496_vm2, %v1101_v16  ;;  %v334_v23 = vpop.f32.mrf.mxu0 }
  0xec   : > { %505 = vrot.lane.b32.xlu0 %v978_v15, %s1100_s15  ;;  %552 = vrot.lane.b32.xlu1 %v981_v18, %s1099_s29  ;;  %494 = vst.msk [vmem:[%s1197_s28 + $0x18] sm:$0xf] %vm487_vm1, %v984_v22  ;;  %v982_v24 = vpack.c.bf16 %v334_v23, %v334_v23  ;;  %v431_v34 = vpop.f32.mrf.mxu1 }
  0xed   : > { %503 = vst.msk [vmem:[%s1197_s28 + $0x18] sm:$0xf] %vm496_vm2, %v1101_v16  ;;  %v1018_v25 = vpop.f32.mrf.mxu0 }
  0xee   : > { %492 = vst.msk [vmem:[%s1197_s28 + $0x10] sm:$0xf] %vm487_vm1, %v982_v24  ;;  %v985_v26 = vpack.c.bf16 %v1018_v25, %v1018_v25  ;;  %v1034_v35 = vpop.f32.mrf.mxu1 }
  0xef   : > { %501 = vst.msk [vmem:[%s1197_s28 + $0x10] sm:$0xf] %vm496_vm2, %v1101_v16  ;;  %v337_v27 = vpop.f32.mrf.mxu0 }
  0xf0   : > { %546 = vrot.lane.b32.xlu0 %v978_v15, %s1099_s29  ;;  %593 = vrot.lane.b32.xlu1 %v981_v18, %s1102_s30  ;;  %495 = vst.msk [vmem:[%s1197_s28 + $0x1c] sm:$0xf] %vm487_vm1, %v985_v26  ;;  %v983_v29 = vpack.c.bf16 %v337_v27, %v337_v27  ;;  %v434_v36 = vpop.f32.mrf.mxu1  ;;  %v663_v62 = vld [vmem:[%s1197_s28 + $0x8] sm:$0xff] (%p1153_p4)  }
  0xf1   : > { %504 = vst.msk [vmem:[%s1197_s28 + $0x1c] sm:$0xf] %vm496_vm2, %v1101_v16  ;;  %664 = vst [vmem:[%s642_s11 + $0x8] sm:$0xff] (%p1153_p4), %v663_v62  }
  0xf2   : > { %493 = vst.msk [vmem:[%s1197_s28 + $0x14] sm:$0xf] %vm487_vm1, %v983_v29  ;;  %v659_v61 = vld [vmem:[%s1197_s28] sm:$0xff] (%p1153_p4)  }
  0xf3   : > { %447 = vst.msk [vmem:[%s207_s8] sm:$0xff] %vm446_vm3, %v415_v30  ;;  %450 = vst.msk [vmem:[%s207_s8 + $0x18] sm:$0xff] %vm446_vm3, %v1030_v31 }
  0xf4   : > { %502 = vst.msk [vmem:[%s1197_s28 + $0x14] sm:$0xf] %vm496_vm2, %v1101_v16  ;;  %587 = vrot.lane.b32.xlu0 %v978_v15, %s1102_s30  ;;  %548 = vrot.lane.b32.xlu1 %v979_v20, %s1099_s29  ;;  %660 = vst [vmem:[%s642_s11] sm:$0xff] (%p1153_p4), %v659_v61  }
  0xf5   : > { %448 = vst.msk [vmem:[%s207_s8 + $0x8] sm:$0xff] %vm446_vm3, %v418_v32  ;;  %453 = vst.msk [vmem:[%s207_s8 + $0x30] sm:$0xff] %vm446_vm3, %v1033_v33 }
  0xf6   : > { %451 = vst.msk [vmem:[%s207_s8 + $0x20] sm:$0xff] %vm446_vm3, %v431_v34  ;;  %454 = vst.msk [vmem:[%s207_s8 + $0x38] sm:$0xff] %vm446_vm3, %v1034_v35 }
  0xf7   : > { %452 = vst.msk [vmem:[%s207_s8 + $0x28] sm:$0xff] %vm446_vm3, %v434_v36 }
  0xf8   : > { %589 = vrot.lane.b32.xlu1 %v979_v20, %s1102_s30  ;;  %507 = vrot.lane.b32.xlu0 %v979_v20, %s1100_s15  ;;  %v671_v0 = vld [vmem:[%s1197_s28 + $0x18] sm:$0xff] (%p1153_p4)  }
  0xf9   : > { %672 = vst [vmem:[%s642_s11 + $0x18] sm:$0xff] (%p1153_p4), %v671_v0  }
  0xfb   : > { %v667_v63 = vld [vmem:[%s1197_s28 + $0x10] sm:$0xff] (%p1153_p4)  }
  0xfc   : > { %517 = vrot.lane.b32.xlu0 %v984_v22, %s1100_s15  ;;  %519 = vrot.lane.b32.xlu1 %v985_v26, %s1100_s15  ;;  %668 = vst [vmem:[%s642_s11 + $0x10] sm:$0xff] (%p1153_p4), %v667_v63  }
 0x100   : > { %558 = vrot.lane.b32.xlu0 %v984_v22, %s1099_s29  ;;  %560 = vrot.lane.b32.xlu1 %v985_v26, %s1099_s29 }
 0x104   : > { %513 = vrot.lane.b32.xlu0 %v982_v24, %s1100_s15  ;;  %515 = vrot.lane.b32.xlu1 %v983_v29, %s1100_s15 }
 0x108   : > { %554 = vrot.lane.b32.xlu0 %v982_v24, %s1099_s29  ;;  %556 = vrot.lane.b32.xlu1 %v983_v29, %s1099_s29 }
 0x10c   : > { %595 = vrot.lane.b32.xlu0 %v982_v24, %s1102_s30  ;;  %597 = vrot.lane.b32.xlu1 %v983_v29, %s1102_s30 }
 0x110   : > { %599 = vrot.lane.b32.xlu0 %v984_v22, %s1102_s30  ;;  %601 = vrot.lane.b32.xlu1 %v985_v26, %s1102_s30 }
 0x156   : > { %v551_v37 = vpop.permute.xlu0 %550  ;;  %v510_v38 = vpop.permute.xlu1 %509 }
 0x157   : > { %943 = vst.msk [vmem:[%s1197_s28 + $0x48] sm:$0xf] %vm487_vm1, %v551_v37  ;;  %927 = vst.msk [vmem:[%s1197_s28 + $0x28] sm:$0xf] %vm487_vm1, %v510_v38 }
 0x158   : > { %951 = vst.msk [vmem:[%s1197_s28 + $0x48] sm:$0xf] %vm496_vm2, %v1101_v16  ;;  %935 = vst.msk [vmem:[%s1197_s28 + $0x28] sm:$0xf] %vm496_vm2, %v1101_v16 }
 0x15a   : > { %v592_v39 = vpop.permute.xlu0 %591  ;;  %v512_v40 = vpop.permute.xlu1 %511 }
 0x15b   : > { %959 = vst.msk [vmem:[%s1197_s28 + $0x68] sm:$0xf] %vm487_vm1, %v592_v39  ;;  %928 = vst.msk [vmem:[%s1197_s28 + $0x2c] sm:$0xf] %vm487_vm1, %v512_v40 }
 0x15c   : > { %967 = vst.msk [vmem:[%s1197_s28 + $0x68] sm:$0xf] %vm496_vm2, %v1101_v16  ;;  %936 = vst.msk [vmem:[%s1197_s28 + $0x2c] sm:$0xf] %vm496_vm2, %v1101_v16 }
 0x15e   : > { %v506_v41 = vpop.permute.xlu0 %505  ;;  %v553_v42 = vpop.permute.xlu1 %552 }
 0x15f   : > { %925 = vst.msk [vmem:[%s1197_s28 + $0x20] sm:$0xf] %vm487_vm1, %v506_v41  ;;  %944 = vst.msk [vmem:[%s1197_s28 + $0x4c] sm:$0xf] %vm487_vm1, %v553_v42 }
 0x160   : > { %933 = vst.msk [vmem:[%s1197_s28 + $0x20] sm:$0xf] %vm496_vm2, %v1101_v16  ;;  %952 = vst.msk [vmem:[%s1197_s28 + $0x4c] sm:$0xf] %vm496_vm2, %v1101_v16 }
 0x162   : > { %v547_v43 = vpop.permute.xlu0 %546  ;;  %v594_v44 = vpop.permute.xlu1 %593 }
 0x163   : > { %941 = vst.msk [vmem:[%s1197_s28 + $0x40] sm:$0xf] %vm487_vm1, %v547_v43  ;;  %960 = vst.msk [vmem:[%s1197_s28 + $0x6c] sm:$0xf] %vm487_vm1, %v594_v44  ;;  %v679_v2 = vld [vmem:[%s1197_s28 + $0x28] sm:$0xff] (%p1153_p4)  }
 0x164   : > { %949 = vst.msk [vmem:[%s1197_s28 + $0x40] sm:$0xf] %vm496_vm2, %v1101_v16  ;;  %968 = vst.msk [vmem:[%s1197_s28 + $0x6c] sm:$0xf] %vm496_vm2, %v1101_v16 }
 0x165   : > { %680 = vst [vmem:[%s642_s11 + $0x48] sm:$0xff] (%p1153_p4), %v679_v2  }
 0x166   : > { %v588_v45 = vpop.permute.xlu0 %587  ;;  %v549_v46 = vpop.permute.xlu1 %548 }
 0x167   : > { %957 = vst.msk [vmem:[%s1197_s28 + $0x60] sm:$0xf] %vm487_vm1, %v588_v45  ;;  %942 = vst.msk [vmem:[%s1197_s28 + $0x44] sm:$0xf] %vm487_vm1, %v549_v46  ;;  %v695_v6 = vld [vmem:[%s1197_s28 + $0x48] sm:$0xff] (%p1153_p4)  }
 0x168   : > { %965 = vst.msk [vmem:[%s1197_s28 + $0x60] sm:$0xf] %vm496_vm2, %v1101_v16  ;;  %950 = vst.msk [vmem:[%s1197_s28 + $0x44] sm:$0xf] %vm496_vm2, %v1101_v16 }
 0x169   : > { %696 = vst [vmem:[%s642_s11 + $0x88] sm:$0xff] (%p1153_p4), %v695_v6  }
 0x16a   : > { %v590_v47 = vpop.permute.xlu1 %589  ;;  %v508_v48 = vpop.permute.xlu0 %507 }
 0x16b   : > { %958 = vst.msk [vmem:[%s1197_s28 + $0x64] sm:$0xf] %vm487_vm1, %v590_v47  ;;  %926 = vst.msk [vmem:[%s1197_s28 + $0x24] sm:$0xf] %vm487_vm1, %v508_v48  ;;  %v711_v10 = vld [vmem:[%s1197_s28 + $0x68] sm:$0xff] (%p1153_p4)  }
 0x16c   : > { %966 = vst.msk [vmem:[%s1197_s28 + $0x64] sm:$0xf] %vm496_vm2, %v1101_v16  ;;  %934 = vst.msk [vmem:[%s1197_s28 + $0x24] sm:$0xf] %vm496_vm2, %v1101_v16 }
 0x16d   : > { %712 = vst [vmem:[%s642_s11 + $0xc8] sm:$0xff] (%p1153_p4), %v711_v10  }
 0x16e   : > { %v518_v49 = vpop.permute.xlu0 %517  ;;  %v520_v50 = vpop.permute.xlu1 %519 }
 0x16f   : > { %931 = vst.msk [vmem:[%s1197_s28 + $0x38] sm:$0xf] %vm487_vm1, %v518_v49  ;;  %932 = vst.msk [vmem:[%s1197_s28 + $0x3c] sm:$0xf] %vm487_vm1, %v520_v50  ;;  %v691_v5 = vld [vmem:[%s1197_s28 + $0x40] sm:$0xff] (%p1153_p4)  }
 0x170   : > { %939 = vst.msk [vmem:[%s1197_s28 + $0x38] sm:$0xf] %vm496_vm2, %v1101_v16  ;;  %940 = vst.msk [vmem:[%s1197_s28 + $0x3c] sm:$0xf] %vm496_vm2, %v1101_v16 }
 0x171   : > { %692 = vst [vmem:[%s642_s11 + $0x80] sm:$0xff] (%p1153_p4), %v691_v5  }
 0x172   : > { %v559_v51 = vpop.permute.xlu0 %558  ;;  %v561_v52 = vpop.permute.xlu1 %560 }
 0x173   : > { %947 = vst.msk [vmem:[%s1197_s28 + $0x58] sm:$0xf] %vm487_vm1, %v559_v51  ;;  %948 = vst.msk [vmem:[%s1197_s28 + $0x5c] sm:$0xf] %vm487_vm1, %v561_v52  ;;  %v675_v1 = vld [vmem:[%s1197_s28 + $0x20] sm:$0xff] (%p1153_p4)  }
 0x174   : > { %955 = vst.msk [vmem:[%s1197_s28 + $0x58] sm:$0xf] %vm496_vm2, %v1101_v16  ;;  %956 = vst.msk [vmem:[%s1197_s28 + $0x5c] sm:$0xf] %vm496_vm2, %v1101_v16  ;;  %v707_v9 = vld [vmem:[%s1197_s28 + $0x60] sm:$0xff] (%p1153_p4)  }
 0x175   : > { %676 = vst [vmem:[%s642_s11 + $0x40] sm:$0xff] (%p1153_p4), %v675_v1   ;;  %708 = vst [vmem:[%s642_s11 + $0xc0] sm:$0xff] (%p1153_p4), %v707_v9  }
 0x176   : > { %v514_v53 = vpop.permute.xlu0 %513  ;;  %v516_v54 = vpop.permute.xlu1 %515 }
 0x177   : > { %929 = vst.msk [vmem:[%s1197_s28 + $0x30] sm:$0xf] %vm487_vm1, %v514_v53  ;;  %930 = vst.msk [vmem:[%s1197_s28 + $0x34] sm:$0xf] %vm487_vm1, %v516_v54  ;;  %v687_v4 = vld [vmem:[%s1197_s28 + $0x38] sm:$0xff] (%p1153_p4)  }
 0x178   : > { %937 = vst.msk [vmem:[%s1197_s28 + $0x30] sm:$0xf] %vm496_vm2, %v1101_v16  ;;  %938 = vst.msk [vmem:[%s1197_s28 + $0x34] sm:$0xf] %vm496_vm2, %v1101_v16 }
 0x179   : > { %688 = vst [vmem:[%s642_s11 + $0x58] sm:$0xff] (%p1153_p4), %v687_v4  }
 0x17a   : > { %v555_v55 = vpop.permute.xlu0 %554  ;;  %v557_v56 = vpop.permute.xlu1 %556 }
 0x17b   : > { %945 = vst.msk [vmem:[%s1197_s28 + $0x50] sm:$0xf] %vm487_vm1, %v555_v55  ;;  %946 = vst.msk [vmem:[%s1197_s28 + $0x54] sm:$0xf] %vm487_vm1, %v557_v56  ;;  %v703_v8 = vld [vmem:[%s1197_s28 + $0x58] sm:$0xff] (%p1153_p4)  }
 0x17c   : > { %953 = vst.msk [vmem:[%s1197_s28 + $0x50] sm:$0xf] %vm496_vm2, %v1101_v16  ;;  %954 = vst.msk [vmem:[%s1197_s28 + $0x54] sm:$0xf] %vm496_vm2, %v1101_v16 }
 0x17d   : > { %704 = vst [vmem:[%s642_s11 + $0x98] sm:$0xff] (%p1153_p4), %v703_v8  }
 0x17e   : > { %v596_v57 = vpop.permute.xlu0 %595  ;;  %v598_v58 = vpop.permute.xlu1 %597 }
 0x17f   : > { %961 = vst.msk [vmem:[%s1197_s28 + $0x70] sm:$0xf] %vm487_vm1, %v596_v57  ;;  %962 = vst.msk [vmem:[%s1197_s28 + $0x74] sm:$0xf] %vm487_vm1, %v598_v58  ;;  %v683_v3 = vld [vmem:[%s1197_s28 + $0x30] sm:$0xff] (%p1153_p4)  }
 0x180   : > { %969 = vst.msk [vmem:[%s1197_s28 + $0x70] sm:$0xf] %vm496_vm2, %v1101_v16  ;;  %970 = vst.msk [vmem:[%s1197_s28 + $0x74] sm:$0xf] %vm496_vm2, %v1101_v16  ;;  %639 = sbr.rel (!%p1153_p4) target bundleno = 397 (0x18d), region = 36 }
 0x181   : > { %684 = vst [vmem:[%s642_s11 + $0x50] sm:$0xff] (%p1153_p4), %v683_v3  }
 0x182   : > { %v600_v59 = vpop.permute.xlu0 %599  ;;  %v602_v60 = vpop.permute.xlu1 %601 }
 0x183   : > { %963 = vst.msk [vmem:[%s1197_s28 + $0x78] sm:$0xf] %vm487_vm1, %v600_v59  ;;  %964 = vst.msk [vmem:[%s1197_s28 + $0x7c] sm:$0xf] %vm487_vm1, %v602_v60  ;;  %v699_v7 = vld [vmem:[%s1197_s28 + $0x50] sm:$0xff] (%p1153_p4)  }
 0x184   : > { %971 = vst.msk [vmem:[%s1197_s28 + $0x78] sm:$0xf] %vm496_vm2, %v1101_v16  ;;  %972 = vst.msk [vmem:[%s1197_s28 + $0x7c] sm:$0xf] %vm496_vm2, %v1101_v16 }
 0x185   : > { %700 = vst [vmem:[%s642_s11 + $0x90] sm:$0xff] %v699_v7  }
 0x187   : > { %v715_v11 = vld [vmem:[%s1197_s28 + $0x70] sm:$0xff]  }
 0x188   : > { %716 = vst [vmem:[%s642_s11 + $0xd0] sm:$0xff] %v715_v11  }
 0x18b   : > { %v719_v12 = vld [vmem:[%s1197_s28 + $0x78] sm:$0xff]  }
 0x18c   : > { %720 = vst [vmem:[%s642_s11 + $0xd8] sm:$0xff] %v719_v12  }
 0x18d PF: > { %p12_p8 = scmp.ge.s32.totalorder %s1143_s19, 4   ;;  %s1433_s15 = smov %s1093_s16 }
 0x18e   : > { %s1434_s16 = smov %s1151_s22  ;;  %s1435_s17 = smov %s1143_s19 }
 0x18f   :  { %14 = sbr.rel (!%p12_p8) target bundleno = 2 (0x2), region = 118 }

// kernel: gat_forward.6
= control target key start
LH: loop header
LB: loop body
LE: loop exit
PB: predicated region body
PF: predicated region fallthrough
CT: control target
= control target key end

     0   :  { %s840_s15 = smov 0   ;;  %s974_s0 = inlined_call_operand.vmem [shape: bf16[128,128], index: 0, kind: input, shape index: {}]   ;;  %s975_s1 = inlined_call_operand.vmem [shape: bf16[128,8], index: 1, kind: input, shape index: {}]   ;;  %s976_s2 = inlined_call_operand.vmem [shape: bf16[128,2], index: 2, kind: input, shape index: {}]   ;;  %s977_s3 = inlined_call_operand.vmem [shape: bf16[1,128,9], index: 3, kind: output, shape index: {0}]   ;;  %s978_s4 = inlined_call_operand.vmem [shape: f32[128,2], index: 4, kind: output, shape index: {1}]  }
   0x1 LB: > { %s656_s16 = sadd.s32 4294967295, %s812_s15   ;;  %p660_p0 = scmp.ge.s32.totalorder %s812_s15, 1  ;;  %s812_s15 = sphi %s840_s15, %s15_s15  }
   0x2   : > { %p166_p1 = scmp.lt.s32.totalorder %s812_s15, 3 }
   0x4   : > { %p167_p2 = pnand %p660_p0, %p166_p1 }
   0x5   : > { %s661_s19 = sshll.u32 (!%p167_p2), %s656_s16, 3 }
   0x6   : > { %170 = sbr.rel (%p167_p2) target bundleno = 256 (0x100), region = 32  ;;  %p198_p3 = scmp.lt.s32.totalorder (!%p167_p2), %s661_s19, 15 }
   0xb   : > { %v786_v0 = vld [vmem:[%s975_s1 + $0x38] sm:$0xff]   ;;  %v788_v2 = vld [vmem:[%s975_s1 + $0x30] sm:$0xff]   ;;  %v790_v4 = vld [vmem:[%s975_s1 + $0x28] sm:$0xff]   ;;  %s980_s19 = smov (!%p198_p3, %s661_s19), 15  ;;  %vm507_vm0 = vcmask 15360   ;;  %vm548_vm1 = vcmask 60416  }
   0xc   : > { %v787_v1 = vld [vmem:[%s976_s2 + $0x38] sm:$0xff]   ;;  %729 = vmatprep.subr.bf16.mxu0 %v786_v0  ;;  %v789_v3 = vld [vmem:[%s976_s2 + $0x30] sm:$0xff]   ;;  %v791_v5 = vld [vmem:[%s976_s2 + $0x28] sm:$0xff]   ;;  %s662_s8 = sshll.u32 %s980_s19, 2  ;;  %s666_s30 = sshll.u32 %s980_s19, 3  ;;  %vm557_vm2 = vcmask 68672  }
   0xd   : > { %753 = vmatprep.subr.bf16.mxu1 %v787_v1  ;;  %730 = vmatpush3.bf16.msra.mxu0 %v786_v0  ;;  %v792_v6 = vld [vmem:[%s975_s1 + $0x20] sm:$0xff]   ;;  %v794_v8 = vld [vmem:[%s975_s1 + $0x18] sm:$0xff]   ;;  %s886_s16 = scalar_lea.vmem %s974_s0, %s662_s8  ;;  %v796_v10 = vld [vmem:[%s975_s1 + $0x10] sm:$0xff]   ;;  %s914_s7 = scalar_lea.vmem %s978_s4, %s666_s30  ;;  %v814_v26 = vmov 1065369472  }
   0xe   : > { %754 = vmatpush3.bf16.msra.mxu1 %v787_v1  ;;  %731 = vmatprep.subr.bf16.mxu0 %v788_v2  ;;  %v793_v7 = vld [vmem:[%s976_s2 + $0x20] sm:$0xff]   ;;  %v795_v9 = vld [vmem:[%s976_s2 + $0x18] sm:$0xff]   ;;  %v797_v12 = vld [vmem:[%s976_s2 + $0x10] sm:$0xff]   ;;  %s921_s11 = scalar_lea.vmem %s977_s3, %s662_s8 }
   0xf   : > { %755 = vmatprep.subr.bf16.mxu1 %v789_v3  ;;  %v802_v11 = vld [vmem:[%s886_s16] sm:$0xff]   ;;  %v798_v13 = vld [vmem:[%s975_s1 + $0x8] sm:$0xff]   ;;  %v804_v18 = vld [vmem:[%s886_s16 + $0x10] sm:$0xff]  }
  0x10   : > { %745 = vmatprep.mubr.bf16.mxu0 %v802_v11  ;;  %769 = vmatprep.mubr.bf16.mxu1 %v802_v11  ;;  %v799_v14 = vld [vmem:[%s976_s2 + $0x8] sm:$0xff]   ;;  %v800_v15 = vld [vmem:[%s975_s1] sm:$0xff]   ;;  %v805_v19 = vld [vmem:[%s886_s16 + $0x18] sm:$0xff]  }
  0x11   : > { %732 = vmatpush3.bf16.msra.mxu0 %v788_v2  ;;  %v801_v16 = vld [vmem:[%s976_s2] sm:$0xff]   ;;  %v803_v17 = vld [vmem:[%s886_s16 + $0x8] sm:$0xff]  }
  0x12   : > { %756 = vmatpush3.bf16.msra.mxu1 %v789_v3  ;;  %733 = vmatprep.subr.bf16.mxu0 %v790_v4 }
  0x13   : > { %757 = vmatprep.subr.bf16.mxu1 %v791_v5 }
  0x15   : > { %734 = vmatpush3.bf16.msra.mxu0 %v790_v4 }
  0x16   : > { %758 = vmatpush3.bf16.msra.mxu1 %v791_v5  ;;  %735 = vmatprep.subr.bf16.mxu0 %v792_v6 }
  0x17   : > { %759 = vmatprep.subr.bf16.mxu1 %v793_v7 }
  0x19   : > { %736 = vmatpush3.bf16.msra.mxu0 %v792_v6 }
  0x1a   : > { %760 = vmatpush3.bf16.msra.mxu1 %v793_v7  ;;  %737 = vmatprep.subr.bf16.mxu0 %v794_v8 }
  0x1b   : > { %761 = vmatprep.subr.bf16.mxu1 %v795_v9 }
  0x1d   : > { %738 = vmatpush3.bf16.msra.mxu0 %v794_v8 }
  0x1e   : > { %762 = vmatpush3.bf16.msra.mxu1 %v795_v9  ;;  %739 = vmatprep.subr.bf16.mxu0 %v796_v10 }
  0x1f   : > { %763 = vmatprep.subr.bf16.mxu1 %v797_v12 }
  0x21   : > { %740 = vmatpush3.bf16.msra.mxu0 %v796_v10 }
  0x22   : > { %764 = vmatpush3.bf16.msra.mxu1 %v797_v12  ;;  %741 = vmatprep.subr.bf16.mxu0 %v798_v13 }
  0x23   : > { %765 = vmatprep.subr.bf16.mxu1 %v799_v14 }
  0x25   : > { %742 = vmatpush3.bf16.msra.mxu0 %v798_v13 }
  0x26   : > { %766 = vmatpush3.bf16.msra.mxu1 %v799_v14  ;;  %743 = vmatprep.subr.bf16.mxu0 %v800_v15 }
  0x27   : > { %767 = vmatprep.subr.bf16.mxu1 %v801_v16 }
  0x29   : > { %744 = vmatpush3.bf16.msra.mxu0 %v800_v15 }
  0x2a   : > { %768 = vmatpush3.bf16.msra.mxu1 %v801_v16 }
  0x2c   : > { %746 = vmatmul.mubr.bf16.vlgmr.msra.gmra.mxu0 %v803_v17 }
  0x2d   : > { %770 = vmatmul.mubr.bf16.vlgmr.msra.gmra.mxu1 %v803_v17  ;;  %749 = vmatprep.mubr.bf16.mxu0 %v804_v18 }
  0x2e   : > { %773 = vmatprep.mubr.bf16.mxu1 %v804_v18 }
  0x34   : > { %750 = vmatmul.mubr.bf16.gmra.mxu0 %v805_v19 }
  0x35   : > { %774 = vmatmul.mubr.bf16.gmra.mxu1 %v805_v19 }
  0xec   : > { %v747_v20 = vpop.f32.mrf.mxu0 }
  0xed   : > { %v699_v21 = vpack.c.bf16 %v747_v20, %v747_v20  ;;  %v771_v22 = vpop.f32.mrf.mxu1 }
  0xee   : > { %510 = vst.msk [vmem:[%s914_s7 + $0x10] sm:$0xff] %vm507_vm0, %v771_v22  ;;  %v347_v23 = vpop.f32.mrf.mxu0 }
  0xef   : > { %551 = vst.msk [vmem:[%s921_s11 + $0x8] sm:$0xf] %vm548_vm1, %v699_v21  ;;  %v697_v24 = vpack.c.bf16 %v347_v23, %v347_v23  ;;  %v476_v25 = vpop.f32.mrf.mxu1 }
  0xf0   : > { %560 = vst.msk [vmem:[%s921_s11 + $0x8] sm:$0xf] %vm557_vm2, %v814_v26  ;;  %v748_v27 = vpop.f32.mrf.mxu0 }
  0xf1   : > { %508 = vst.msk [vmem:[%s914_s7] sm:$0xff] %vm507_vm0, %v476_v25  ;;  %v700_v28 = vpack.c.bf16 %v748_v27, %v748_v27  ;;  %v772_v29 = vpop.f32.mrf.mxu1 }
  0xf2   : > { %549 = vst.msk [vmem:[%s921_s11] sm:$0xf] %vm548_vm1, %v697_v24  ;;  %v350_v30 = vpop.f32.mrf.mxu0 }
  0xf3   : > { %558 = vst.msk [vmem:[%s921_s11] sm:$0xf] %vm557_vm2, %v814_v26  ;;  %v698_v31 = vpack.c.bf16 %v350_v30, %v350_v30  ;;  %v479_v32 = vpop.f32.mrf.mxu1 }
  0xf4   : > { %511 = vst.msk [vmem:[%s914_s7 + $0x18] sm:$0xff] %vm507_vm0, %v772_v29  ;;  %509 = vst.msk [vmem:[%s914_s7 + $0x8] sm:$0xff] %vm507_vm0, %v479_v32  ;;  %v751_v33 = vpop.f32.mrf.mxu0 }
  0xf5   : > { %552 = vst.msk [vmem:[%s921_s11 + $0xc] sm:$0xf] %vm548_vm1, %v700_v28  ;;  %550 = vst.msk [vmem:[%s921_s11 + $0x4] sm:$0xf] %vm548_vm1, %v698_v31  ;;  %v703_v34 = vpack.c.bf16 %v751_v33, %v751_v33  ;;  %v775_v35 = vpop.f32.mrf.mxu1 }
  0xf6   : > { %561 = vst.msk [vmem:[%s921_s11 + $0xc] sm:$0xf] %vm557_vm2, %v814_v26  ;;  %559 = vst.msk [vmem:[%s921_s11 + $0x4] sm:$0xf] %vm557_vm2, %v814_v26  ;;  %v363_v36 = vpop.f32.mrf.mxu0 }
  0xf7   : > { %514 = vst.msk [vmem:[%s914_s7 + $0x30] sm:$0xff] %vm507_vm0, %v775_v35  ;;  %v701_v37 = vpack.c.bf16 %v363_v36, %v363_v36  ;;  %v492_v38 = vpop.f32.mrf.mxu1 }
  0xf8   : > { %555 = vst.msk [vmem:[%s921_s11 + $0x18] sm:$0xf] %vm548_vm1, %v703_v34  ;;  %v752_v39 = vpop.f32.mrf.mxu0 }
  0xf9   : > { %564 = vst.msk [vmem:[%s921_s11 + $0x18] sm:$0xf] %vm557_vm2, %v814_v26  ;;  %v704_v40 = vpack.c.bf16 %v752_v39, %v752_v39  ;;  %v776_v41 = vpop.f32.mrf.mxu1 }
  0xfa   : > { %512 = vst.msk [vmem:[%s914_s7 + $0x20] sm:$0xff] %vm507_vm0, %v492_v38  ;;  %515 = vst.msk [vmem:[%s914_s7 + $0x38] sm:$0xff] %vm507_vm0, %v776_v41  ;;  %v366_v42 = vpop.f32.mrf.mxu0 }
  0xfb   : > { %553 = vst.msk [vmem:[%s921_s11 + $0x10] sm:$0xf] %vm548_vm1, %v701_v37  ;;  %556 = vst.msk [vmem:[%s921_s11 + $0x1c] sm:$0xf] %vm548_vm1, %v704_v40  ;;  %v702_v43 = vpack.c.bf16 %v366_v42, %v366_v42  ;;  %v495_v44 = vpop.f32.mrf.mxu1 }
  0xfc   : > { %562 = vst.msk [vmem:[%s921_s11 + $0x10] sm:$0xf] %vm557_vm2, %v814_v26  ;;  %565 = vst.msk [vmem:[%s921_s11 + $0x1c] sm:$0xf] %vm557_vm2, %v814_v26 }
  0xfd   : > { %513 = vst.msk [vmem:[%s914_s7 + $0x28] sm:$0xff] %vm507_vm0, %v495_v44 }
  0xfe   : > { %554 = vst.msk [vmem:[%s921_s11 + $0x14] sm:$0xf] %vm548_vm1, %v702_v43 }
  0xff   : > { %563 = vst.msk [vmem:[%s921_s11 + $0x14] sm:$0xf] %vm557_vm2, %v814_v26 }
 0x100 PF: > { %s15_s15 = sadd.s32 1, %s812_s15  }
 0x101   : > { %p12_p4 = scmp.ge.s32.totalorder %s15_s15, 4  }
 0x103   :  { %14 = sbr.rel (!%p12_p4) target bundleno = 1 (0x1), region = 74 }

// kernel: gat_forward.7
= control target key start
LH: loop header
LB: loop body
LE: loop exit
PB: predicated region body
PF: predicated region fallthrough
CT: control target
= control target key end

     0   :  { %s815_s15 = smov 0   ;;  %s916_s0 = inlined_call_operand.vmem [shape: f32[128,1], index: 0, kind: input, shape index: {}]   ;;  %s917_s1 = inlined_call_operand.vmem [shape: f32[1,128], index: 1, kind: input, shape index: {}]   ;;  %s918_s2 = inlined_call_operand.vmem [shape: bf16[128,128], index: 2, kind: input, shape index: {}]   ;;  %s919_s3 = inlined_call_operand.vmem [shape: bf16[1,128,9], index: 3, kind: input, shape index: {}]   ;;  %s920_s4 = inlined_call_operand.vmem [shape: f32[128,8], index: 4, kind: output, shape index: {}]  }
   0x1 LB: > { %s633_s16 = sadd.s32 4294967295, %s786_s15   ;;  %p637_p0 = scmp.ge.s32.totalorder %s786_s15, 1  ;;  %s786_s15 = sphi %s815_s15, %s14_s15  }
   0x2   : > { %p174_p1 = scmp.lt.s32.totalorder %s786_s15, 3 }
   0x4   : > { %p175_p2 = pnand %p637_p0, %p174_p1 }
   0x5   : > { %s638_s17 = sshll.u32 (!%p175_p2), %s633_s16, 3 }
   0x6   : > { %178 = sbr.rel (%p175_p2) target bundleno = 678 (0x2a6), region = 36  ;;  %p206_p3 = scmp.lt.s32.totalorder (!%p175_p2), %s638_s17, 15 }
   0xb   : > { %v788_v0 = vmov 0   ;;  %s922_s17 = smov (!%p206_p3, %s638_s17), 15  ;;  %v644_v9 = vld [vmem:[%s917_s1] ss:$0 sm:$0xff]  ;;  %v740_v57 = vld [vmem:[%s919_s3 + $0x38] sm:$0xff]   ;;  %v741_v62 = vld [vmem:[%s919_s3 + $0x30] sm:$0xff]  }
   0xc   : > { %737 = vset.pattern.permute.xlu1 %v788_v0  ;;  %736 = vset.pattern.permute.xlu0 %v788_v0  ;;  %s639_s18 = sshll.u32 %s922_s17, 3  ;;  %s641_s22 = sshll.u32 %s922_s17, 2  ;;  %v742_v0 = vld [vmem:[%s919_s3 + $0x28] sm:$0xff]   ;;  %vm556_vm0 = vcmask 64512  }
   0xd   : > { %s209_s21 = scalar_lea.vmem %s916_s0, %s639_s18  ;;  %s835_s25 = scalar_lea.vmem %s918_s2, %s641_s22  ;;  %686 = vmatprep.subr.bf16.mxu0 %v740_v57  ;;  %710 = vmatprep.subr.bf16.mxu1 %v740_v57 }
   0xe   : > { %v228_v1 = vld [vmem:[%s209_s21 + $0x20] sm:$0xff]  ;;  %v229_v3 = vld [vmem:[%s209_s21 + $0x28] sm:$0xff]  ;;  %v227_v5 = vld [vmem:[%s209_s21 + $0x18] sm:$0xff]  ;;  %687 = vmatpush3.bf16.msra.mxu0 %v740_v57  ;;  %718 = vmatpush3.bf16.msra.mxu1 %v740_v57  ;;  %s221_s23 = scalar_lea.vmem %s920_s4, %s639_s18 }
   0xf   : > { %v224_v2 = vld [vmem:[%s209_s21] sm:$0xff]  ;;  %271 = vperm.xlu1 %737, %v228_v1   ;;  %v225_v4 = vld [vmem:[%s209_s21 + $0x8] sm:$0xff]  ;;  %v226_v6 = vld [vmem:[%s209_s21 + $0x10] sm:$0xff]  ;;  %688 = vmatprep.subr.bf16.mxu0 %v741_v62 }
  0x10   : > { %251 = vperm.xlu0 %736, %v224_v2   ;;  %v231_v7 = vld [vmem:[%s209_s21 + $0x38] sm:$0xff]  ;;  %v230_v8 = vld [vmem:[%s209_s21 + $0x30] sm:$0xff]  ;;  %v656_v12 = vld [vmem:[%s835_s25] sm:$0xff]   ;;  %711 = vmatprep.subr.bf16.mxu1 %v741_v62 }
  0x11   : > { %v657_v17 = vunpack.c.l.bf16 %v656_v12  ;;  %v672_v18 = vld [vmem:[%s835_s25 + $0x10] sm:$0xff]   ;;  %v658_v25 = vunpack.c.h.bf16 %v656_v12  ;;  %v671_v30 = vld [vmem:[%s835_s25 + $0x8] sm:$0xff]   ;;  %v673_v43 = vld [vmem:[%s835_s25 + $0x18] sm:$0xff]  }
  0x12   : > { %v665_v24 = vunpack.c.l.bf16 %v672_v18  ;;  %v666_v37 = vunpack.c.h.bf16 %v672_v18  ;;  %v661_v38 = vunpack.c.l.bf16 %v671_v30  ;;  %v662_v50 = vunpack.c.h.bf16 %v671_v30  ;;  %689 = vmatpush3.bf16.msra.mxu0 %v741_v62  ;;  %719 = vmatpush3.bf16.msra.mxu1 %v741_v62  ;;  %v743_v1 = vld [vmem:[%s919_s3 + $0x20] sm:$0xff]   ;;  %v744_v2 = vld [vmem:[%s919_s3 + $0x18] sm:$0xff]  }
  0x13   : > { %276 = vperm.xlu1 %737, %v229_v3   ;;  %v669_v51 = vunpack.c.l.bf16 %v673_v43  ;;  %v670_v61 = vunpack.c.h.bf16 %v673_v43  ;;  %690 = vmatprep.subr.bf16.mxu0 %v742_v0  ;;  %v745_v3 = vld [vmem:[%s919_s3 + $0x10] sm:$0xff]  }
  0x14   : > { %256 = vperm.xlu0 %736, %v225_v4   ;;  %712 = vmatprep.subr.bf16.mxu1 %v742_v0  ;;  %v746_v4 = vld [vmem:[%s919_s3 + $0x8] sm:$0xff]  }
  0x16   : > { %691 = vmatpush3.bf16.msra.mxu0 %v742_v0  ;;  %720 = vmatpush3.bf16.msra.mxu1 %v742_v0 }
  0x17   : > { %266 = vperm.xlu1 %737, %v227_v5   ;;  %692 = vmatprep.subr.bf16.mxu0 %v743_v1  ;;  %v747_v5 = vld [vmem:[%s919_s3] sm:$0xff]  }
  0x18   : > { %261 = vperm.xlu0 %736, %v226_v6   ;;  %713 = vmatprep.subr.bf16.mxu1 %v743_v1 }
  0x1a   : > { %693 = vmatpush3.bf16.msra.mxu0 %v743_v1  ;;  %721 = vmatpush3.bf16.msra.mxu1 %v743_v1 }
  0x1b   : > { %286 = vperm.xlu1 %737, %v231_v7   ;;  %694 = vmatprep.subr.bf16.mxu0 %v744_v2 }
  0x1c   : > { %281 = vperm.xlu0 %736, %v230_v8   ;;  %714 = vmatprep.subr.bf16.mxu1 %v744_v2 }
  0x1e   : > { %695 = vmatpush3.bf16.msra.mxu0 %v744_v2  ;;  %722 = vmatpush3.bf16.msra.mxu1 %v744_v2 }
  0x1f   : > { %696 = vmatprep.subr.bf16.mxu0 %v745_v3  ;;  %715 = vmatprep.subr.bf16.mxu1 %v745_v3 }
  0x22   : > { %697 = vmatpush3.bf16.msra.mxu0 %v745_v3  ;;  %723 = vmatpush3.bf16.msra.mxu1 %v745_v3 }
  0x23   : > { %698 = vmatprep.subr.bf16.mxu0 %v746_v4  ;;  %716 = vmatprep.subr.bf16.mxu1 %v746_v4 }
  0x26   : > { %699 = vmatpush3.bf16.msra.mxu0 %v746_v4  ;;  %724 = vmatpush3.bf16.msra.mxu1 %v746_v4 }
  0x27   : > { %700 = vmatprep.subr.bf16.mxu0 %v747_v5  ;;  %717 = vmatprep.subr.bf16.mxu1 %v747_v5 }
  0x2a   : > { %701 = vmatpush3.bf16.msra.mxu0 %v747_v5  ;;  %725 = vmatpush3.bf16.msra.mxu1 %v747_v5 }
  0x8a   : > { %v272_v10 = vpop.permute.xlu1 %271 }
  0x8b   : > { %v252_v11 = vpop.permute.xlu0 %251  ;;  %v299_v13 = vadd.f32 %v644_v9, %v272_v10 }
  0x8c   : > { %v295_v14 = vadd.f32 %v644_v9, %v252_v11 }
  0x8d   : > { %v307_v15 = vmul.f32 0.2, %v299_v13 }
  0x8e   : > { %v303_v16 = vmul.f32 0.2, %v295_v14  ;;  %v277_v19 = vpop.permute.xlu1 %276 }
  0x8f   : > { %v257_v20 = vpop.permute.xlu0 %256  ;;  %v300_v22 = vadd.f32 %v644_v9, %v277_v19  ;;  %v315_v26 = vmax.f32 %v299_v13, %v307_v15 }
  0x90   : > { %v311_v21 = vmax.f32 %v295_v14, %v303_v16  ;;  %v296_v23 = vadd.f32 %v644_v9, %v257_v20 }
  0x91   : > { %v308_v27 = vmul.f32 0.2, %v300_v22  ;;  %v846_v41 = vadd.f32 %v665_v24, %v315_v26 }
  0x92   : > { %v304_v28 = vmul.f32 0.2, %v296_v23  ;;  %v842_v29 = vadd.f32 %v657_v17, %v311_v21  ;;  %v267_v31 = vpop.permute.xlu1 %266 }
  0x93   : > { %v262_v32 = vpop.permute.xlu0 %261  ;;  %v298_v34 = vadd.f32 %v644_v9, %v267_v31  ;;  %v316_v36 = vmax.f32 %v300_v22, %v308_v27 }
  0x94   : > { %v312_v33 = vmax.f32 %v296_v23, %v304_v28  ;;  %v297_v35 = vadd.f32 %v644_v9, %v262_v32  ;;  %327 = vmax.xlane.f32.xlu0 %v842_v29 }
  0x95   : > { %v306_v39 = vmul.f32 0.2, %v298_v34  ;;  %v853_v49 = vadd.f32 %v666_v37, %v316_v36 }
  0x96   : > { %v305_v40 = vmul.f32 0.2, %v297_v35  ;;  %v848_v42 = vadd.f32 %v658_v25, %v312_v33  ;;  %v287_v44 = vpop.permute.xlu1 %286 }
  0x97   : > { %v282_v45 = vpop.permute.xlu0 %281  ;;  %v302_v47 = vadd.f32 %v644_v9, %v287_v44  ;;  %v314_v52 = vmax.f32 %v298_v34, %v306_v39 }
  0x98   : > { %v313_v46 = vmax.f32 %v297_v35, %v305_v40  ;;  %v301_v48 = vadd.f32 %v644_v9, %v282_v45  ;;  %335 = vmax.xlane.f32.xlu0 %v846_v41  ;;  %329 = vmax.xlane.f32.xlu1 %v848_v42 }
  0x99   : > { %v310_v53 = vmul.f32 0.2, %v302_v47  ;;  %v862_v59 = vadd.f32 %v662_v50, %v314_v52 }
  0x9a   : > { %v309_v54 = vmul.f32 0.2, %v301_v48  ;;  %v855_v55 = vadd.f32 %v661_v38, %v313_v46 }
  0x9b   : > { %v318_v58 = vmax.f32 %v302_v47, %v310_v53 }
  0x9c   : > { %v317_v56 = vmax.f32 %v301_v48, %v309_v54  ;;  %337 = vmax.xlane.f32.xlu0 %v853_v49  ;;  %331 = vmax.xlane.f32.xlu1 %v855_v55 }
  0x9d   : > { %v871_v63 = vadd.f32 %v670_v61, %v318_v58 }
  0x9e   : > { %v864_v60 = vadd.f32 %v669_v51, %v317_v56 }
  0xa0   : > { %333 = vmax.xlane.f32.xlu0 %v862_v59  ;;  %339 = vmax.xlane.f32.xlu1 %v864_v60 }
  0xa4   : > { %341 = vmax.xlane.f32.xlu0 %v871_v63 }
 0x11d   : > { %v328_v6 = vpop.xlane.xlu0 %327 }
 0x11e   : > { %v343_v7 = vsub.f32 %v842_v29, %v328_v6 }
 0x120   : > { %v351_v9 = vmul.f32 1.442695, %v343_v7 }
 0x121   : > { %v336_v8 = vpop.xlane.xlu0 %335  ;;  %v330_v10 = vpop.xlane.xlu1 %329 }
 0x122   : > { %v347_v11 = vsub.f32 %v846_v41, %v336_v8  ;;  %v344_v12 = vsub.f32 %v848_v42, %v330_v10  ;;  %748 = vpow2.f32 %v351_v9  ;;  %v789_v42 = vmov 8  }
 0x123   : > { %738 = vset.pattern.permute.xlu1 %v789_v42  ;;  %739 = vset.pattern.permute.xlu0 %v789_v42 }
 0x124   : > { %v353_v13 = vmul.f32 1.442695, %v344_v12  ;;  %v359_v14 = vmul.f32 1.442695, %v347_v11 }
 0x125   : > { %v338_v15 = vpop.xlane.xlu0 %337  ;;  %v332_v16 = vpop.xlane.xlu1 %331 }
 0x126   : > { %v348_v17 = vsub.f32 %v853_v49, %v338_v15  ;;  %750 = vpow2.f32 %v353_v13  ;;  %v345_v18 = vsub.f32 %v855_v55, %v332_v16 }
 0x127   : > { %752 = vpow2.f32 %v359_v14 }
 0x128   : > { %v361_v19 = vmul.f32 1.442695, %v348_v17  ;;  %v355_v20 = vmul.f32 1.442695, %v345_v18 }
 0x129   : > { %v334_v21 = vpop.xlane.xlu0 %333  ;;  %v340_v22 = vpop.xlane.xlu1 %339 }
 0x12a   : > { %754 = vpow2.f32 %v361_v19  ;;  %v346_v23 = vsub.f32 %v862_v59, %v334_v21  ;;  %v349_v24 = vsub.f32 %v864_v60, %v340_v22 }
 0x12b   : > { %756 = vpow2.f32 %v355_v20 }
 0x12c   : > { %v357_v25 = vmul.f32 1.442695, %v346_v23  ;;  %v363_v26 = vmul.f32 1.442695, %v349_v24 }
 0x12d   : > { %v342_v27 = vpop.xlane.xlu0 %341 }
 0x12e   : > { %758 = vpow2.f32 %v357_v25  ;;  %v350_v28 = vsub.f32 %v871_v63, %v342_v27 }
 0x12f   : > { %760 = vpow2.f32 %v363_v26  ;;  %v749_v30 = vpop.eup %748 }
 0x130   : > { %v365_v29 = vmul.f32 1.442695, %v350_v28 }
 0x132   : > { %762 = vpow2.f32 %v365_v29 }
 0x133   : > { %v751_v31 = vpop.eup %750 }
 0x134   : > { %v367_v32 = vpack.c.bf16 %v751_v31, %v749_v30  ;;  %v753_v33 = vpop.eup %752 }
 0x136   : > { %702 = vmatprep.mubr.bf16.mxu0 %v367_v32 }
 0x137   : > { %v755_v34 = vpop.eup %754 }
 0x138   : > { %v369_v35 = vpack.c.bf16 %v755_v34, %v753_v33  ;;  %v757_v36 = vpop.eup %756 }
 0x13a   : > { %706 = vmatprep.mubr.bf16.mxu1 %v369_v35 }
 0x13b   : > { %v759_v37 = vpop.eup %758 }
 0x13c   : > { %v368_v38 = vpack.c.bf16 %v759_v37, %v757_v36  ;;  %v761_v39 = vpop.eup %760 }
 0x13e   : > { %703 = vmatmul.mubr.bf16.vlgmr.msra.gmra.mxu0 %v368_v38 }
 0x13f   : > { %v763_v40 = vpop.eup %762 }
 0x140   : > { %v370_v41 = vpack.c.bf16 %v763_v40, %v761_v39 }
 0x142   : > { %707 = vmatmul.mubr.bf16.vlgmr.msra.gmra.mxu1 %v370_v41 }
 0x1fe   : > { %v704_v43 = vpop.f32.mrf.mxu0 }
 0x200   : > { %v469_v44 = vpop.f32.mrf.mxu0 }
 0x201   : > { %764 = vrcp.f32 %v469_v44 }
 0x202   : > { %v705_v45 = vpop.f32.mrf.mxu0  ;;  %766 = vrcp.f32 %v704_v43  ;;  %v708_v47 = vpop.f32.mrf.mxu1 }
 0x204   : > { %v472_v46 = vpop.f32.mrf.mxu0  ;;  %v485_v48 = vpop.f32.mrf.mxu1 }
 0x205   : > { %768 = vrcp.f32 %v472_v46 }
 0x206   : > { %770 = vrcp.f32 %v705_v45  ;;  %v709_v50 = vpop.f32.mrf.mxu1 }
 0x207   : > { %772 = vrcp.f32 %v485_v48 }
 0x208   : > { %774 = vrcp.f32 %v708_v47  ;;  %v488_v53 = vpop.f32.mrf.mxu1 }
 0x209   : > { %776 = vrcp.f32 %v488_v53 }
 0x20a   : > { %778 = vrcp.f32 %v709_v50 }
 0x20e   : > { %v765_v49 = vpop.eup %764 }
 0x20f   : > { %510 = vperm.xlu1 %738, %v765_v49   ;;  %v767_v51 = vpop.eup %766 }
 0x212   : > { %v769_v52 = vpop.eup %768 }
 0x213   : > { %520 = vperm.xlu1 %738, %v767_v51   ;;  %515 = vperm.xlu0 %739, %v769_v52   ;;  %v771_v54 = vpop.eup %770 }
 0x214   : > { %v773_v55 = vpop.eup %772 }
 0x215   : > { %v775_v56 = vpop.eup %774 }
 0x216   : > { %v777_v57 = vpop.eup %776 }
 0x217   : > { %525 = vperm.xlu1 %738, %v771_v54   ;;  %v779_v58 = vpop.eup %778 }
 0x21b   : > { %530 = vperm.xlu1 %738, %v773_v55  }
 0x21f   : > { %540 = vperm.xlu1 %738, %v775_v56  }
 0x223   : > { %535 = vperm.xlu1 %738, %v777_v57  }
 0x227   : > { %545 = vperm.xlu1 %738, %v779_v58  }
 0x28a   : > { %v511_v59 = vpop.permute.xlu1 %510 }
 0x28b   : > { %v548_v60 = vmul.f32 %v511_v59, %v469_v44 }
 0x28d   : > { %557 = vst.msk [vmem:[%s221_s23] sm:$0xff] %vm556_vm0, %v548_v60 }
 0x28e   : > { %v521_v61 = vpop.permute.xlu1 %520  ;;  %v516_v62 = vpop.permute.xlu0 %515 }
 0x28f   : > { %v550_v63 = vmul.f32 %v704_v43, %v521_v61  ;;  %v549_v0 = vmul.f32 %v516_v62, %v472_v46 }
 0x291   : > { %559 = vst.msk [vmem:[%s221_s23 + $0x10] sm:$0xff] %vm556_vm0, %v550_v63  ;;  %558 = vst.msk [vmem:[%s221_s23 + $0x8] sm:$0xff] %vm556_vm0, %v549_v0 }
 0x292   : > { %v526_v1 = vpop.permute.xlu1 %525 }
 0x293   : > { %v551_v2 = vmul.f32 %v705_v45, %v526_v1 }
 0x295   : > { %560 = vst.msk [vmem:[%s221_s23 + $0x18] sm:$0xff] %vm556_vm0, %v551_v2 }
 0x296   : > { %v531_v3 = vpop.permute.xlu1 %530 }
 0x297   : > { %v552_v4 = vmul.f32 %v531_v3, %v485_v48 }
 0x299   : > { %561 = vst.msk [vmem:[%s221_s23 + $0x20] sm:$0xff] %vm556_vm0, %v552_v4 }
 0x29a   : > { %v541_v5 = vpop.permute.xlu1 %540 }
 0x29b   : > { %v554_v6 = vmul.f32 %v708_v47, %v541_v5 }
 0x29d   : > { %563 = vst.msk [vmem:[%s221_s23 + $0x30] sm:$0xff] %vm556_vm0, %v554_v6 }
 0x29e   : > { %v536_v7 = vpop.permute.xlu1 %535 }
 0x29f   : > { %v553_v8 = vmul.f32 %v536_v7, %v488_v53 }
 0x2a1   : > { %562 = vst.msk [vmem:[%s221_s23 + $0x28] sm:$0xff] %vm556_vm0, %v553_v8 }
 0x2a2   : > { %v546_v9 = vpop.permute.xlu1 %545 }
 0x2a3   : > { %v555_v10 = vmul.f32 %v709_v50, %v546_v9 }
 0x2a5   : > { %564 = vst.msk [vmem:[%s221_s23 + $0x38] sm:$0xff] %vm556_vm0, %v555_v10 }
 0x2a6 PF: > { %s14_s15 = sadd.s32 1, %s786_s15  }
 0x2a7   : > { %p11_p4 = scmp.ge.s32.totalorder %s14_s15, 4  }
 0x2a9   :  { %13 = sbr.rel (!%p11_p4) target bundleno = 1 (0x1), region = 69 }

// kernel: gat_forward.5
= control target key start
LH: loop header
LB: loop body
LE: loop exit
PB: predicated region body
PF: predicated region fallthrough
CT: control target
= control target key end

     0   :  { %s2135_s15 = smov 0   ;;  %s2725_s0 = inlined_call_operand.vmem [shape: f32[128,4], index: 0, kind: input, shape index: {}]   ;;  %s2726_s1 = inlined_call_operand.vmem [shape: f32[4,128], index: 1, kind: input, shape index: {}]   ;;  %s2727_s2 = inlined_call_operand.vmem [shape: bf16[128,128], index: 2, kind: input, shape index: {}]   ;;  %s2728_s3 = inlined_call_operand.vmem [shape: bf16[4,128,33], index: 3, kind: input, shape index: {}]   ;;  %s2729_s4 = inlined_call_operand.vmem [shape: f32[128,128], index: 4, kind: output, shape index: {}]  }
   0x1 LB: > { %s1648_s16 = sadd.s32 4294967295, %s2100_s15   ;;  %p1652_p0 = scmp.ge.s32.totalorder %s2100_s15, 1  ;;  %s2100_s15 = sphi %s2135_s15, %s14_s15  }
   0x2   : > { %p174_p1 = scmp.lt.s32.totalorder %s2100_s15, 3 }
   0x4   : > { %p175_p2 = pnand %p1652_p0, %p174_p1 }
   0x5   : > { %s1653_s17 = sshll.u32 (!%p175_p2), %s1648_s16, 3 }
   0x6   : > { %178 = sbr.rel (%p175_p2) target bundleno = 844 (0x34c), region = 36  ;;  %p206_p3 = scmp.lt.s32.totalorder (!%p175_p2), %s1653_s17, 15 }
   0xb   : > { %v2102_v0 = vmov 0   ;;  %s2731_s17 = smov (!%p206_p3, %s1653_s17), 15  ;;  %v2103_v6 = vmov 1   ;;  %v2104_v10 = vmov 2   ;;  %v2105_v11 = vmov 3   ;;  %v1934_v12 = vld [vmem:[%s2728_s3 + $0x38] sm:$0xff]  }
   0xc   : > { %1921 = vset.pattern.permute.xlu1 %v2102_v0  ;;  %1920 = vset.pattern.permute.xlu0 %v2102_v0  ;;  %s1654_s18 = sshll.u32 %s2731_s17, 3  ;;  %v289_v13 = vlaneseq  ;;  %v2160_v16 = vld [vmem:[%s2726_s1] sm:$0xf]  ;;  %s1656_s26 = sshll.u32 %s2731_s17, 2  ;;  %v1935_v60 = vld [vmem:[%s2728_s3 + $0x30] sm:$0xff]   ;;  %vm554_vm0 = vcmask 261120  }
   0xd   : > { %s209_s21 = scalar_lea.vmem %s2725_s0, %s1654_s18  ;;  %1808 = vmatprep.subr.bf16.mxu0 %v1934_v12  ;;  %s2169_s29 = scalar_lea.vmem %s2727_s2, %s1656_s26  ;;  %vm893_vm1 = vcmask 523520   ;;  %vm1232_vm2 = vcmask 785920   ;;  %vm1571_vm3 = vcmask 1048320  }
   0xe   : > { %v226_v1 = vld [vmem:[%s209_s21 + $0x10] sm:$0xff]  ;;  %v224_v2 = vld [vmem:[%s209_s21] sm:$0xff]  ;;  %v227_v3 = vld [vmem:[%s209_s21 + $0x18] sm:$0xff]  ;;  %1809 = vmatpush3.bf16.msra.mxu0 %v1934_v12  ;;  %v2154_v14 = vshrl.u32 %v289_v13, 7  ;;  %s2600_s25 = scalar_lea.vmem %s2729_s4, %s1654_s18  ;;  %s2107_s17 = smov 32  }
   0xf   : > { %261 = vperm.xlu1 %1921, %v226_v1   ;;  %251 = vperm.xlu0 %1920, %v224_v2   ;;  %v225_v4 = vld [vmem:[%s209_s21 + $0x8] sm:$0xff]  ;;  %v228_v7 = vld [vmem:[%s209_s21 + $0x20] sm:$0xff]  ;;  %v230_v8 = vld [vmem:[%s209_s21 + $0x30] sm:$0xff]  ;;  %s2108_s18 = smov 64   ;;  %s2109_s26 = smov 96  }
  0x10   : > { %v229_v5 = vld [vmem:[%s209_s21 + $0x28] sm:$0xff]  ;;  %v231_v9 = vld [vmem:[%s209_s21 + $0x38] sm:$0xff]  ;;  %v291_v15 = vsub.s32 0, %v2154_v14  ;;  %v1742_v20 = vld [vmem:[%s2169_s29] sm:$0xff]   ;;  %v597_v22 = vsub.s32 1, %v2154_v14  ;;  %1810 = vmatprep.subr.bf16.mxu0 %v1935_v60 }
  0x11   : > { %v2175_v25 = vunpack.c.l.bf16 %v1742_v20  ;;  %v1757_v31 = vld [vmem:[%s2169_s29 + $0x8] sm:$0xff]   ;;  %v2185_v34 = vunpack.c.h.bf16 %v1742_v20 }
  0x12   : > { %v2164_v17 = vrot.slane %v2160_v16, %v291_v15  ;;  %v2181_v32 = vrot.slane %v2160_v16, %v597_v22  ;;  %v2183_v33 = vunpack.c.h.bf16 %v1757_v31  ;;  %v2198_v46 = vunpack.c.l.bf16 %v1757_v31  ;;  %1811 = vmatpush3.bf16.msra.mxu0 %v1935_v60 }
  0x13   : > { %266 = vperm.xlu1 %1921, %v227_v3   ;;  %256 = vperm.xlu0 %1920, %v225_v4  }
  0x17   : > { %1922 = vset.pattern.permute.xlu1 %v2103_v6  ;;  %276 = vperm.xlu0 %1920, %v229_v5  }
  0x18   : > { %568 = vperm.xlu1 %1922, %v225_v4  }
  0x1b   : > { %1924 = vset.pattern.permute.xlu0 %v2103_v6 }
  0x1c   : > { %572 = vperm.xlu1 %1922, %v226_v1   ;;  %564 = vperm.xlu0 %1924, %v224_v2  }
  0x20   : > { %1923 = vset.pattern.permute.xlu1 %v2102_v0  ;;  %576 = vperm.xlu0 %1924, %v227_v3  }
  0x21   : > { %271 = vperm.xlu1 %1923, %v228_v7  }
  0x24   : > { %580 = vperm.xlu0 %1924, %v228_v7  }
  0x25   : > { %281 = vperm.xlu1 %1923, %v230_v8  }
  0x28   : > { %592 = vperm.xlu0 %1924, %v231_v9  }
  0x29   : > { %286 = vperm.xlu1 %1923, %v231_v9  }
  0x2c   : > { %1927 = vset.pattern.permute.xlu0 %v2104_v10 }
  0x2d   : > { %1925 = vset.pattern.permute.xlu1 %v2103_v6  ;;  %907 = vperm.xlu0 %1927, %v225_v4  }
  0x2e   : > { %584 = vperm.xlu1 %1925, %v229_v5  }
  0x31   : > { %923 = vperm.xlu0 %1927, %v229_v5  }
  0x32   : > { %588 = vperm.xlu1 %1925, %v230_v8  }
  0x35   : > { %1930 = vset.pattern.permute.xlu0 %v2105_v11 }
  0x36   : > { %1926 = vset.pattern.permute.xlu1 %v2104_v10  ;;  %1242 = vperm.xlu0 %1930, %v224_v2  }
  0x37   : > { %903 = vperm.xlu1 %1926, %v224_v2   ;;  %v1758_v2 = vld [vmem:[%s2169_s29 + $0x10] sm:$0xff]  }
  0x38   : > { %v2229_v13 = vunpack.c.l.bf16 %v1758_v2 }
  0x3a   : > { %1254 = vperm.xlu0 %1930, %v227_v3  }
  0x3b   : > { %911 = vperm.xlu1 %1926, %v226_v1  }
  0x3e   : > { %1258 = vperm.xlu0 %1930, %v228_v7  }
  0x3f   : > { %915 = vperm.xlu1 %1926, %v227_v3  }
  0x42   : > { %1270 = vperm.xlu0 %1930, %v231_v9  }
  0x43   : > { %1928 = vset.pattern.permute.xlu1 %v2105_v11 }
  0x44   : > { %1246 = vperm.xlu1 %1928, %v225_v4  }
  0x48   : > { %1250 = vperm.xlu1 %1928, %v226_v1  }
  0x4c   : > { %1929 = vset.pattern.permute.xlu1 %v2104_v10  ;;  %v2223_v10 = vunpack.c.h.bf16 %v1758_v2 }
  0x4d   : > { %919 = vperm.xlu1 %1929, %v228_v7  }
  0x51   : > { %927 = vperm.xlu1 %1929, %v230_v8  }
  0x55   : > { %931 = vperm.xlu1 %1929, %v231_v9  }
  0x59   : > { %1931 = vset.pattern.permute.xlu1 %v2105_v11  ;;  %v1936_v11 = vld [vmem:[%s2728_s3 + $0x28] sm:$0xff]  }
  0x5a   : > { %1262 = vperm.xlu1 %1931, %v229_v5   ;;  %1812 = vmatprep.subr.bf16.mxu0 %v1936_v11 }
  0x5b   : > { %1813 = vmatpush3.bf16.msra.mxu0 %v1936_v11  ;;  %v1945_v11 = vld [vmem:[%s2728_s3 + $0x58] sm:$0xff]  }
  0x5e   : > { %1266 = vperm.xlu1 %1931, %v230_v8  }
  0x8a   : > { %v262_v18 = vpop.permute.xlu1 %261  ;;  %v252_v19 = vpop.permute.xlu0 %251 }
  0x8b   : > { %v293_v21 = vadd.f32 %v2164_v17, %v252_v19  ;;  %v295_v23 = vadd.f32 %v2164_v17, %v262_v18  ;;  %v936_v18 = vsub.s32 2, %v2154_v14  ;;  %v1937_v19 = vld [vmem:[%s2728_s3 + $0x78] sm:$0xff]  }
  0x8c   : > { %1832 = vmatprep.subr.bf16.mxu1 %v1937_v19 }
  0x8d   : > { %v301_v24 = vmul.f32 0.2, %v293_v21  ;;  %v303_v35 = vmul.f32 0.2, %v295_v23  ;;  %1833 = vmatpush3.bf16.msra.mxu1 %v1937_v19 }
  0x8e   : > { %v267_v26 = vpop.permute.xlu1 %266  ;;  %v257_v27 = vpop.permute.xlu0 %256 }
  0x8f   : > { %v296_v28 = vadd.f32 %v2164_v17, %v267_v26  ;;  %v294_v29 = vadd.f32 %v2164_v17, %v257_v27  ;;  %v309_v30 = vmax.f32 %v293_v21, %v301_v24  ;;  %v311_v47 = vmax.f32 %v295_v23, %v303_v35  ;;  %v1759_v24 = vld [vmem:[%s2169_s29 + $0x18] sm:$0xff]  }
  0x90   : > { %v2249_v31 = vunpack.c.l.bf16 %v1759_v24  ;;  %v2252_v35 = vrot.slane %v2160_v16, %v936_v18 }
  0x91   : > { %v304_v36 = vmul.f32 0.2, %v296_v28  ;;  %v302_v37 = vmul.f32 0.2, %v294_v29  ;;  %v2188_v38 = vadd.f32 %v2175_v25, %v309_v30  ;;  %v2206_v55 = vadd.f32 %v2198_v46, %v311_v47 }
  0x92   : > { %v277_v39 = vpop.permute.xlu0 %276 }
  0x93   : > { %v569_v40 = vpop.permute.xlu1 %568  ;;  %325 = vmax.xlane.f32.xlu1 %v2188_v38  ;;  %v312_v41 = vmax.f32 %v296_v28, %v304_v36  ;;  %v310_v42 = vmax.f32 %v294_v29, %v302_v37  ;;  %v298_v54 = vadd.f32 %v2164_v17, %v277_v39  ;;  %v1938_v29 = vld [vmem:[%s2728_s3 + $0x20] sm:$0xff]   ;;  %v1939_v36 = vld [vmem:[%s2728_s3 + $0x70] sm:$0xff]  }
  0x94   : > { %v600_v43 = vadd.f32 %v2181_v32, %v569_v40  ;;  %1814 = vmatprep.subr.bf16.mxu0 %v1938_v29  ;;  %1834 = vmatprep.subr.bf16.mxu1 %v1939_v36 }
  0x95   : > { %v2193_v44 = vadd.f32 %v2183_v33, %v312_v41  ;;  %v2196_v45 = vadd.f32 %v2185_v34, %v310_v42  ;;  %v306_v0 = vmul.f32 0.2, %v298_v54  ;;  %v2263_v42 = vunpack.c.h.bf16 %v1759_v24  ;;  %1815 = vmatpush3.bf16.msra.mxu0 %v1938_v29  ;;  %1835 = vmatpush3.bf16.msra.mxu1 %v1939_v36 }
  0x96   : > { %v608_v48 = vmul.f32 0.2, %v600_v43 }
  0x97   : > { %v573_v49 = vpop.permute.xlu1 %572  ;;  %331 = vmax.xlane.f32.xlu1 %v2193_v44  ;;  %327 = vmax.xlane.f32.xlu0 %v2196_v45  ;;  %v565_v50 = vpop.permute.xlu0 %564  ;;  %v314_v15 = vmax.f32 %v298_v54, %v306_v0 }
  0x98   : > { %v601_v51 = vadd.f32 %v2181_v32, %v573_v49  ;;  %v599_v52 = vadd.f32 %v2181_v32, %v565_v50  ;;  %v616_v53 = vmax.f32 %v600_v43, %v608_v48  ;;  %v1940_v48 = vld [vmem:[%s2728_s3 + $0x18] sm:$0xff]  }
  0x99   : > { %v2261_v40 = vadd.f32 %v2223_v10, %v314_v15  ;;  %1816 = vmatprep.subr.bf16.mxu0 %v1940_v48 }
  0x9a   : > { %v609_v56 = vmul.f32 0.2, %v601_v51  ;;  %v607_v57 = vmul.f32 0.2, %v599_v52  ;;  %v2209_v58 = vadd.f32 %v2185_v34, %v616_v53  ;;  %1817 = vmatpush3.bf16.msra.mxu0 %v1940_v48 }
  0x9b   : > { %329 = vmax.xlane.f32.xlu0 %v2206_v55  ;;  %v577_v59 = vpop.permute.xlu0 %576 }
  0x9c   : > { %v602_v61 = vadd.f32 %v2181_v32, %v577_v59  ;;  %v272_v62 = vpop.permute.xlu1 %271  ;;  %633 = vmax.xlane.f32.xlu1 %v2209_v58  ;;  %v615_v63 = vmax.f32 %v599_v52, %v607_v57  ;;  %v617_v5 = vmax.f32 %v601_v51, %v609_v56  ;;  %v1941_v51 = vld [vmem:[%s2728_s3 + $0x68] sm:$0xff]   ;;  %v1275_v59 = vsub.s32 3, %v2154_v14  ;;  %v1943_v14 = vld [vmem:[%s2728_s3 + $0x60] sm:$0xff]  }
  0x9d   : > { %v297_v1 = vadd.f32 %v2164_v17, %v272_v62  ;;  %1836 = vmatprep.subr.bf16.mxu1 %v1941_v51 }
  0x9e   : > { %v610_v3 = vmul.f32 0.2, %v602_v61  ;;  %v2220_v4 = vadd.f32 %v2175_v25, %v615_v63  ;;  %v2237_v21 = vadd.f32 %v2198_v46, %v617_v5  ;;  %v1942_v63 = vld [vmem:[%s2728_s3 + $0x10] sm:$0xff]   ;;  %1837 = vmatpush3.bf16.msra.mxu1 %v1941_v51 }
  0x9f   : > { %v305_v6 = vmul.f32 0.2, %v297_v1  ;;  %v581_v7 = vpop.permute.xlu0 %580  ;;  %1818 = vmatprep.subr.bf16.mxu0 %v1942_v63  ;;  %1838 = vmatprep.subr.bf16.mxu1 %v1943_v14 }
  0xa0   : > { %v282_v8 = vpop.permute.xlu1 %281  ;;  %631 = vmax.xlane.f32.xlu0 %v2220_v4  ;;  %v618_v9 = vmax.f32 %v602_v61, %v610_v3  ;;  %v603_v20 = vadd.f32 %v2181_v32, %v581_v7  ;;  %1819 = vmatpush3.bf16.msra.mxu0 %v1942_v63 }
  0xa1   : > { %v299_v12 = vadd.f32 %v2164_v17, %v282_v8  ;;  %v313_v23 = vmax.f32 %v297_v1, %v305_v6  ;;  %v2298_v6 = vrot.slane %v2160_v16, %v1275_v59  ;;  %v1949_v59 = vld [vmem:[%s2728_s3 + $0x40] sm:$0xff]  }
  0xa2   : > { %v2240_v22 = vadd.f32 %v2183_v33, %v618_v9  ;;  %v611_v37 = vmul.f32 0.2, %v603_v20  ;;  %1839 = vmatpush3.bf16.msra.mxu1 %v1943_v14 }
  0xa3   : > { %v307_v26 = vmul.f32 0.2, %v299_v12  ;;  %v593_v27 = vpop.permute.xlu0 %592  ;;  %v2258_v39 = vadd.f32 %v2229_v13, %v313_v23  ;;  %1840 = vmatprep.subr.bf16.mxu1 %v1945_v11 }
  0xa4   : > { %v287_v28 = vpop.permute.xlu1 %286  ;;  %635 = vmax.xlane.f32.xlu0 %v2237_v21  ;;  %637 = vmax.xlane.f32.xlu1 %v2240_v22  ;;  %v606_v43 = vadd.f32 %v2181_v32, %v593_v27  ;;  %v619_v52 = vmax.f32 %v603_v20, %v611_v37 }
  0xa5   : > { %v300_v30 = vadd.f32 %v2164_v17, %v287_v28  ;;  %v315_v41 = vmax.f32 %v299_v12, %v307_v26  ;;  %v1946_v26 = vld [vmem:[%s2728_s3] sm:$0xff]   ;;  %v1947_v28 = vld [vmem:[%s2728_s3 + $0x50] sm:$0xff]  }
  0xa6   : > { %v614_v60 = vmul.f32 0.2, %v606_v43  ;;  %v2295_v3 = vadd.f32 %v2229_v13, %v619_v52  ;;  %1841 = vmatpush3.bf16.msra.mxu1 %v1945_v11 }
  0xa7   : > { %v308_v17 = vmul.f32 0.2, %v300_v30  ;;  %v2276_v54 = vadd.f32 %v2249_v31, %v315_v41  ;;  %1842 = vmatprep.subr.bf16.mxu1 %v1947_v28 }
  0xa8   : > { %333 = vmax.xlane.f32.xlu0 %v2258_v39  ;;  %335 = vmax.xlane.f32.xlu1 %v2261_v40  ;;  %v908_v47 = vpop.permute.xlu0 %907  ;;  %v622_v7 = vmax.f32 %v606_v43, %v614_v60 }
  0xa9   : > { %v585_v49 = vpop.permute.xlu1 %584  ;;  %v316_v50 = vmax.f32 %v300_v30, %v308_v17  ;;  %v939_v56 = vadd.f32 %v2252_v35, %v908_v47  ;;  %v1948_v47 = vld [vmem:[%s2728_s3 + $0x48] sm:$0xff]  }
  0xaa   : > { %v604_v53 = vadd.f32 %v2181_v32, %v585_v49  ;;  %v2317_v24 = vadd.f32 %v2263_v42, %v622_v7  ;;  %1843 = vmatpush3.bf16.msra.mxu1 %v1947_v28 }
  0xab   : > { %v2280_v57 = vadd.f32 %v2263_v42, %v316_v50  ;;  %v947_v2 = vmul.f32 0.2, %v939_v56  ;;  %1844 = vmatprep.subr.bf16.mxu1 %v1948_v47 }
  0xac   : > { %v612_v61 = vmul.f32 0.2, %v604_v53  ;;  %337 = vmax.xlane.f32.xlu0 %v2276_v54  ;;  %v2284_v62 = vpop.permute.xlu0 %923 }
  0xad   : > { %v589_v0 = vpop.permute.xlu1 %588  ;;  %339 = vmax.xlane.f32.xlu1 %v2280_v57  ;;  %v955_v16 = vmax.f32 %v939_v56, %v947_v2 }
  0xae   : > { %v605_v1 = vadd.f32 %v2181_v32, %v589_v0  ;;  %v620_v5 = vmax.f32 %v604_v53, %v612_v61  ;;  %v1944_v32 = vld [vmem:[%s2728_s3 + $0x8] sm:$0xff]   ;;  %1845 = vmatpush3.bf16.msra.mxu1 %v1948_v47 }
  0xaf   : > { %1820 = vmatprep.subr.bf16.mxu0 %v1944_v32  ;;  %v2328_v30 = vadd.f32 %v2185_v34, %v955_v16  ;;  %1846 = vmatprep.subr.bf16.mxu1 %v1949_v59 }
  0xb0   : > { %v613_v8 = vmul.f32 0.2, %v605_v1  ;;  %639 = vmax.xlane.f32.xlu0 %v2295_v3  ;;  %v2302_v9 = vadd.f32 %v2223_v10, %v620_v5  ;;  %1821 = vmatpush3.bf16.msra.mxu0 %v1944_v32  ;;  %v943_v5 = vadd.f32 %v2252_v35, %v2284_v62 }
  0xb1   : > { %v1243_v15 = vpop.permute.xlu0 %1242  ;;  %1822 = vmatprep.subr.bf16.mxu0 %v1946_v26 }
  0xb2   : > { %v904_v12 = vpop.permute.xlu1 %903  ;;  %641 = vmax.xlane.f32.xlu1 %v2302_v9  ;;  %v621_v18 = vmax.f32 %v605_v1, %v613_v8  ;;  %v1277_v20 = vadd.f32 %v2298_v6, %v1243_v15  ;;  %v2355_v1 = vld [vmem:[%s2728_s3 + $0xb8] sm:$0xff]   ;;  %1847 = vmatpush3.bf16.msra.mxu1 %v1949_v59  ;;  %v951_v16 = vmul.f32 0.2, %v943_v5 }
  0xb3   : > { %v938_v19 = vadd.f32 %v2252_v35, %v904_v12 }
  0xb4   : > { %v2314_v23 = vadd.f32 %v2249_v31, %v621_v18  ;;  %v1285_v36 = vmul.f32 0.2, %v1277_v20  ;;  %1823 = vmatpush3.bf16.msra.mxu0 %v1946_v26  ;;  %v2374_v26 = vld [vmem:[%s2728_s3 + $0xf8] sm:$0xff]  }
  0xb5   : > { %v946_v27 = vmul.f32 0.2, %v938_v19  ;;  %v1255_v52 = vpop.permute.xlu0 %1254  ;;  %1856 = vmatprep.subr.bf16.mxu0 %v2355_v1  ;;  %1880 = vmatprep.subr.bf16.mxu1 %v2374_v26 }
  0xb6   : > { %v912_v29 = vpop.permute.xlu1 %911  ;;  %643 = vmax.xlane.f32.xlu0 %v2314_v23  ;;  %645 = vmax.xlane.f32.xlu1 %v2317_v24  ;;  %v1293_v49 = vmax.f32 %v1277_v20, %v1285_v36  ;;  %v1280_v60 = vadd.f32 %v2298_v6, %v1255_v52 }
  0xb7   : > { %v940_v37 = vadd.f32 %v2252_v35, %v912_v29  ;;  %v954_v41 = vmax.f32 %v938_v19, %v946_v27  ;;  %v959_v27 = vmax.f32 %v943_v5, %v951_v16 }
  0xb8   : > { %v2349_v0 = vadd.f32 %v2175_v25, %v1293_v49  ;;  %v1288_v7 = vmul.f32 0.2, %v1280_v60 }
  0xb9   : > { %v948_v17 = vmul.f32 0.2, %v940_v37  ;;  %v2332_v43 = vadd.f32 %v2175_v25, %v954_v41  ;;  %v1259_v28 = vpop.permute.xlu0 %1258 }
  0xba   : > { %v916_v48 = vpop.permute.xlu1 %915  ;;  %972 = vmax.xlane.f32.xlu1 %v2328_v30  ;;  %v1296_v12 = vmax.f32 %v1280_v60, %v1288_v7 }
  0xbb   : > { %v941_v50 = vadd.f32 %v2252_v35, %v916_v48  ;;  %970 = vmax.xlane.f32.xlu0 %v2332_v43  ;;  %v956_v51 = vmax.f32 %v940_v37, %v948_v17  ;;  %v2388_v48 = vadd.f32 %v2223_v10, %v959_v27 }
  0xbc   : > { %v2380_v36 = vadd.f32 %v2183_v33, %v1296_v12 }
  0xbd   : > { %v949_v53 = vmul.f32 0.2, %v941_v50  ;;  %v2341_v56 = vadd.f32 %v2198_v46, %v956_v51  ;;  %v1271_v51 = vpop.permute.xlu0 %1270 }
  0xbf   : > { %v1247_v61 = vpop.permute.xlu1 %1246  ;;  %974 = vmax.xlane.f32.xlu0 %v2341_v56  ;;  %v957_v63 = vmax.f32 %v941_v50, %v949_v53 }
  0xc0   : > { %v1278_v14 = vadd.f32 %v2298_v6, %v1247_v61 }
  0xc1   : > { %v2358_v2 = vadd.f32 %v2183_v33, %v957_v63  ;;  %v1284_v63 = vadd.f32 %v2298_v6, %v1271_v51 }
  0xc2   : > { %v1286_v8 = vmul.f32 0.2, %v1278_v14 }
  0xc3   : > { %v1251_v25 = vpop.permute.xlu1 %1250  ;;  %976 = vmax.xlane.f32.xlu1 %v2358_v2  ;;  %1309 = vmax.xlane.f32.xlu0 %v2349_v0 }
  0xc4   : > { %v1279_v32 = vadd.f32 %v2298_v6, %v1251_v25  ;;  %v1294_v11 = vmax.f32 %v1278_v14, %v1286_v8  ;;  %v1292_v25 = vmul.f32 0.2, %v1284_v63 }
  0xc6   : > { %v1287_v15 = vmul.f32 0.2, %v1279_v32  ;;  %v2367_v18 = vadd.f32 %v2185_v34, %v1294_v11  ;;  %v1281_v34 = vadd.f32 %v2298_v6, %v1259_v28 }
  0xc8   : > { %v920_v19 = vpop.permute.xlu1 %919  ;;  %1311 = vmax.xlane.f32.xlu1 %v2367_v18  ;;  %v1295_v62 = vmax.f32 %v1279_v32, %v1287_v15  ;;  %v1300_v15 = vmax.f32 %v1284_v63, %v1292_v25 }
  0xc9   : > { %v942_v20 = vadd.f32 %v2252_v35, %v920_v19 }
  0xca   : > { %v2377_v29 = vadd.f32 %v2198_v46, %v1295_v62  ;;  %v1289_v46 = vmul.f32 0.2, %v1281_v34  ;;  %v2419_v27 = vadd.f32 %v2263_v42, %v1300_v15 }
  0xcb   : > { %v950_v37 = vmul.f32 0.2, %v942_v20 }
  0xcc   : > { %v928_v41 = vpop.permute.xlu1 %927  ;;  %1313 = vmax.xlane.f32.xlu0 %v2377_v29  ;;  %1315 = vmax.xlane.f32.xlu1 %v2380_v36  ;;  %v1297_v59 = vmax.f32 %v1281_v34, %v1289_v46 }
  0xcd   : > { %v944_v17 = vadd.f32 %v2252_v35, %v928_v41  ;;  %v958_v47 = vmax.f32 %v942_v20, %v950_v37 }
  0xcf   : > { %v952_v49 = vmul.f32 0.2, %v944_v17  ;;  %v2391_v33 = vadd.f32 %v2229_v13, %v958_v47 }
  0xd0   : > { %v932_v50 = vpop.permute.xlu1 %931  ;;  %980 = vmax.xlane.f32.xlu1 %v2388_v48 }
  0xd1   : > { %v945_v52 = vadd.f32 %v2252_v35, %v932_v50  ;;  %978 = vmax.xlane.f32.xlu0 %v2391_v33  ;;  %v960_v53 = vmax.f32 %v944_v17, %v952_v49  ;;  %v2406_v35 = vadd.f32 %v2229_v13, %v1297_v59 }
  0xd3   : > { %v953_v60 = vmul.f32 0.2, %v945_v52  ;;  %v2397_v61 = vadd.f32 %v2249_v31, %v960_v53 }
  0xd5   : > { %v1263_v14 = vpop.permute.xlu1 %1262  ;;  %982 = vmax.xlane.f32.xlu0 %v2397_v61  ;;  %v961_v5 = vmax.f32 %v945_v52, %v953_v60 }
  0xd6   : > { %v1282_v7 = vadd.f32 %v2298_v6, %v1263_v14 }
  0xd7   : > { %v2403_v8 = vadd.f32 %v2263_v42, %v961_v5 }
  0xd8   : > { %v1290_v32 = vmul.f32 0.2, %v1282_v7 }
  0xd9   : > { %v1267_v11 = vpop.permute.xlu1 %1266  ;;  %984 = vmax.xlane.f32.xlu1 %v2403_v8  ;;  %1317 = vmax.xlane.f32.xlu0 %v2406_v35 }
  0xda   : > { %v1298_v16 = vmax.f32 %v1282_v7, %v1290_v32  ;;  %v1283_v12 = vadd.f32 %v2298_v6, %v1267_v11 }
  0xdc   : > { %v1291_v19 = vmul.f32 0.2, %v1283_v12  ;;  %v2412_v62 = vadd.f32 %v2223_v10, %v1298_v16 }
  0xde   : > { %v1299_v20 = vmax.f32 %v1283_v12, %v1291_v19  ;;  %1319 = vmax.xlane.f32.xlu1 %v2412_v62 }
  0xe0   : > { %v2416_v13 = vadd.f32 %v2249_v31, %v1299_v20 }
  0xe2   : > { %1321 = vmax.xlane.f32.xlu0 %v2416_v13  ;;  %1323 = vmax.xlane.f32.xlu1 %v2419_v27 }
 0x11c   : > { %v326_v28 = vpop.xlane.xlu1 %325 }
 0x11d   : > { %v341_v6 = vsub.f32 %v2188_v38, %v326_v28 }
 0x11f   : > { %v349_v10 = vmul.f32 1.442695, %v341_v6 }
 0x120   : > { %v332_v34 = vpop.xlane.xlu1 %331  ;;  %v328_v37 = vpop.xlane.xlu0 %327 }
 0x121   : > { %v344_v41 = vsub.f32 %v2193_v44, %v332_v34  ;;  %v342_v17 = vsub.f32 %v2196_v45, %v328_v37  ;;  %1966 = vpow2.f32 %v349_v10 }
 0x123   : > { %v351_v47 = vmul.f32 1.442695, %v342_v17  ;;  %v355_v31 = vmul.f32 1.442695, %v344_v41 }
 0x124   : > { %v330_v46 = vpop.xlane.xlu0 %329 }
 0x125   : > { %v343_v42 = vsub.f32 %v2206_v55, %v330_v46  ;;  %v634_v49 = vpop.xlane.xlu1 %633  ;;  %1968 = vpow2.f32 %v351_v47 }
 0x126   : > { %v648_v50 = vsub.f32 %v2209_v58, %v634_v49  ;;  %1970 = vpow2.f32 %v355_v31 }
 0x127   : > { %v353_v51 = vmul.f32 1.442695, %v343_v42 }
 0x128   : > { %v657_v38 = vmul.f32 1.442695, %v648_v50 }
 0x129   : > { %1972 = vpow2.f32 %v353_v51  ;;  %v632_v52 = vpop.xlane.xlu0 %631 }
 0x12a   : > { %v647_v53 = vsub.f32 %v2220_v4, %v632_v52  ;;  %1974 = vpow2.f32 %v657_v38 }
 0x12c   : > { %v655_v44 = vmul.f32 1.442695, %v647_v53  ;;  %v1955_v53 = vld [vmem:[%s2728_s3 + $0xf0] sm:$0xff]  }
 0x12d   : > { %v638_v45 = vpop.xlane.xlu1 %637  ;;  %v636_v59 = vpop.xlane.xlu0 %635 }
 0x12e   : > { %1976 = vpow2.f32 %v655_v44  ;;  %v650_v60 = vsub.f32 %v2240_v22, %v638_v45  ;;  %v649_v55 = vsub.f32 %v2237_v21, %v636_v59  ;;  %v1967_v7 = vpop.eup %1966 }
 0x130   : > { %v661_v63 = vmul.f32 1.442695, %v650_v60  ;;  %v659_v14 = vmul.f32 1.442695, %v649_v55  ;;  %v1956_v55 = vld [vmem:[%s2728_s3 + $0x98] sm:$0xff]  }
 0x131   : > { %v336_v5 = vpop.xlane.xlu1 %335  ;;  %v334_v58 = vpop.xlane.xlu0 %333 }
 0x132   : > { %1978 = vpow2.f32 %v661_v63  ;;  %v346_v25 = vsub.f32 %v2261_v40, %v336_v5  ;;  %v345_v32 = vsub.f32 %v2258_v39, %v334_v58  ;;  %v1969_v4 = vpop.eup %1968  ;;  %v1951_v39 = vld [vmem:[%s2728_s3 + $0xb0] sm:$0xff]   ;;  %v1957_v58 = vld [vmem:[%s2728_s3 + $0xe8] sm:$0xff]  }
 0x133   : > { %1980 = vpow2.f32 %v659_v14  ;;  %v365_v12 = vpack.c.bf16 %v1969_v4, %v1967_v7  ;;  %v1971_v15 = vpop.eup %1970 }
 0x134   : > { %v359_v11 = vmul.f32 1.442695, %v346_v25  ;;  %v357_v16 = vmul.f32 1.442695, %v345_v32 }
 0x135   : > { %v338_v19 = vpop.xlane.xlu0 %337  ;;  %1824 = vmatprep.mubr.bf16.mxu0 %v365_v12  ;;  %v1960_v12 = vld [vmem:[%s2728_s3 + $0x88] sm:$0xff]  }
 0x136   : > { %v1973_v22 = vpop.eup %1972  ;;  %1982 = vpow2.f32 %v359_v11  ;;  %v347_v21 = vsub.f32 %v2276_v54, %v338_v19  ;;  %v340_v20 = vpop.xlane.xlu1 %339 }
 0x137   : > { %1984 = vpow2.f32 %v357_v16  ;;  %v348_v28 = vsub.f32 %v2280_v57, %v340_v20  ;;  %v366_v6 = vpack.c.bf16 %v1971_v15, %v1973_v22  ;;  %v1975_v10 = vpop.eup %1974  ;;  %v1952_v57 = vld [vmem:[%s2728_s3 + $0xa8] sm:$0xff]   ;;  %v1959_v16 = vld [vmem:[%s2728_s3 + $0xe0] sm:$0xff]  }
 0x138   : > { %v361_v40 = vmul.f32 1.442695, %v347_v21 }
 0x139   : > { %v363_v34 = vmul.f32 1.442695, %v348_v28  ;;  %1825 = vmatmul.mubr.bf16.vlgmr.msra.gmra.mxu0 %v366_v6  ;;  %v640_v37 = vpop.xlane.xlu0 %639  ;;  %v1961_v6 = vld [vmem:[%s2728_s3 + $0xd8] sm:$0xff]  }
 0x13a   : > { %1986 = vpow2.f32 %v361_v40  ;;  %v651_v41 = vsub.f32 %v2295_v3, %v640_v37  ;;  %1857 = vmatpush3.bf16.msra.mxu0 %v2355_v1  ;;  %v1954_v1 = vld [vmem:[%s2728_s3 + $0xa0] sm:$0xff]  }
 0x13b   : > { %v1977_v54 = vpop.eup %1976  ;;  %1988 = vpow2.f32 %v363_v34  ;;  %v642_v17 = vpop.xlane.xlu1 %641  ;;  %1858 = vmatprep.subr.bf16.mxu0 %v1951_v39  ;;  %v1962_v34 = vld [vmem:[%s2728_s3 + $0x80] sm:$0xff]  }
 0x13c   : > { %v663_v47 = vmul.f32 1.442695, %v651_v41  ;;  %v652_v31 = vsub.f32 %v2302_v9, %v642_v17  ;;  %v671_v46 = vpack.c.bf16 %v1975_v10, %v1977_v54  ;;  %v1963_v10 = vld [vmem:[%s2728_s3 + $0xd0] sm:$0xff]  }
 0x13e   : > { %v665_v42 = vmul.f32 1.442695, %v652_v31  ;;  %1848 = vmatprep.mubr.bf16.mxu1 %v671_v46  ;;  %1859 = vmatpush3.bf16.msra.mxu0 %v1951_v39  ;;  %1990 = vpow2.f32 %v663_v47 }
 0x13f   : > { %v1979_v49 = vpop.eup %1978  ;;  %v646_v3 = vpop.xlane.xlu1 %645  ;;  %1860 = vmatprep.subr.bf16.mxu0 %v1952_v57 }
 0x140   : > { %v644_v50 = vpop.xlane.xlu0 %643  ;;  %v1981_v51 = vpop.eup %1980  ;;  %1992 = vpow2.f32 %v665_v42  ;;  %v654_v38 = vsub.f32 %v2317_v24, %v646_v3  ;;  %v1964_v42 = vld [vmem:[%s2728_s3 + $0xc8] sm:$0xff]  }
 0x141   : > { %v653_v52 = vsub.f32 %v2314_v23, %v644_v50  ;;  %v672_v9 = vpack.c.bf16 %v1979_v49, %v1981_v51 }
 0x142   : > { %v669_v44 = vmul.f32 1.442695, %v654_v38  ;;  %1861 = vmatpush3.bf16.msra.mxu0 %v1952_v57 }
 0x143   : > { %v667_v45 = vmul.f32 1.442695, %v653_v52  ;;  %v1983_v59 = vpop.eup %1982  ;;  %1849 = vmatmul.mubr.bf16.vlgmr.msra.gmra.mxu1 %v672_v9  ;;  %v973_v60 = vpop.xlane.xlu1 %972  ;;  %1862 = vmatprep.subr.bf16.mxu0 %v1954_v1  ;;  %v1965_v52 = vld [vmem:[%s2728_s3 + $0xc0] sm:$0xff]  }
 0x144   : > { %v1985_v63 = vpop.eup %1984  ;;  %1994 = vpow2.f32 %v669_v44  ;;  %v987_v23 = vsub.f32 %v2328_v30, %v973_v60  ;;  %v971_v24 = vpop.xlane.xlu0 %970  ;;  %1881 = vmatpush3.bf16.msra.mxu1 %v2374_v26  ;;  %v1958_v30 = vld [vmem:[%s2728_s3 + $0x90] sm:$0xff]  }
 0x145   : > { %1996 = vpow2.f32 %v667_v45  ;;  %v986_v14 = vsub.f32 %v2332_v43, %v971_v24  ;;  %v367_v5 = vpack.c.bf16 %v1983_v59, %v1985_v63  ;;  %1882 = vmatprep.subr.bf16.mxu1 %v1955_v53 }
 0x146   : > { %v996_v7 = vmul.f32 1.442695, %v987_v23  ;;  %1863 = vmatpush3.bf16.msra.mxu0 %v1954_v1 }
 0x147   : > { %v1987_v25 = vpop.eup %1986  ;;  %v994_v32 = vmul.f32 1.442695, %v986_v14  ;;  %1828 = vmatprep.mubr.bf16.mxu0 %v367_v5  ;;  %1864 = vmatprep.subr.bf16.mxu0 %v1956_v55 }
 0x148   : > { %v1989_v26 = vpop.eup %1988  ;;  %1998 = vpow2.f32 %v996_v7  ;;  %v975_v4 = vpop.xlane.xlu0 %974  ;;  %1883 = vmatpush3.bf16.msra.mxu1 %v1955_v53 }
 0x149   : > { %2000 = vpow2.f32 %v994_v32  ;;  %v988_v43 = vsub.f32 %v2341_v56, %v975_v4  ;;  %v368_v11 = vpack.c.bf16 %v1989_v26, %v1987_v25  ;;  %1884 = vmatprep.subr.bf16.mxu1 %v1957_v58 }
 0x14a   : > { %1865 = vmatpush3.bf16.msra.mxu0 %v1956_v55 }
 0x14b   : > { %1829 = vmatmul.mubr.bf16.gmra.mxu0 %v368_v11  ;;  %1866 = vmatprep.subr.bf16.mxu0 %v1958_v30  ;;  %v1991_v15 = vpop.eup %1990  ;;  %v998_v19 = vmul.f32 1.442695, %v988_v43 }
 0x14c   : > { %v977_v22 = vpop.xlane.xlu1 %976  ;;  %v1310_v21 = vpop.xlane.xlu0 %1309  ;;  %1885 = vmatpush3.bf16.msra.mxu1 %v1957_v58 }
 0x14d   : > { %v1993_v20 = vpop.eup %1992  ;;  %v989_v56 = vsub.f32 %v2358_v2, %v977_v22  ;;  %v1325_v28 = vsub.f32 %v2349_v0, %v1310_v21  ;;  %1886 = vmatprep.subr.bf16.mxu1 %v1959_v16  ;;  %2002 = vpow2.f32 %v998_v19 }
 0x14e   : > { %v673_v39 = vpack.c.bf16 %v1993_v20, %v1991_v15  ;;  %1867 = vmatpush3.bf16.msra.mxu0 %v1958_v30 }
 0x14f   : > { %v1000_v40 = vmul.f32 1.442695, %v989_v56  ;;  %1868 = vmatprep.subr.bf16.mxu0 %v1960_v12  ;;  %v1333_v2 = vmul.f32 1.442695, %v1325_v28 }
 0x150   : > { %1852 = vmatprep.mubr.bf16.mxu1 %v673_v39  ;;  %1887 = vmatpush3.bf16.msra.mxu1 %v1959_v16 }
 0x151   : > { %v1995_v37 = vpop.eup %1994  ;;  %2004 = vpow2.f32 %v1000_v40  ;;  %v1312_v0 = vpop.xlane.xlu1 %1311  ;;  %1888 = vmatprep.subr.bf16.mxu1 %v1961_v6 }
 0x152   : > { %v1997_v41 = vpop.eup %1996  ;;  %v1326_v54 = vsub.f32 %v2367_v18, %v1312_v0  ;;  %1869 = vmatpush3.bf16.msra.mxu0 %v1960_v12  ;;  %2006 = vpow2.f32 %v1333_v2 }
 0x153   : > { %v674_v17 = vpack.c.bf16 %v1995_v37, %v1997_v41  ;;  %1870 = vmatprep.subr.bf16.mxu0 %v1962_v34 }
 0x154   : > { %v1335_v57 = vmul.f32 1.442695, %v1326_v54  ;;  %1889 = vmatpush3.bf16.msra.mxu1 %v1961_v6 }
 0x155   : > { %v1999_v47 = vpop.eup %1998  ;;  %1853 = vmatmul.mubr.bf16.gmra.mxu1 %v674_v17  ;;  %v1316_v31 = vpop.xlane.xlu1 %1315  ;;  %1890 = vmatprep.subr.bf16.mxu1 %v1963_v10 }
 0x156   : > { %v1314_v46 = vpop.xlane.xlu0 %1313  ;;  %v2001_v49 = vpop.eup %2000  ;;  %2008 = vpow2.f32 %v1335_v57  ;;  %v1328_v3 = vsub.f32 %v2380_v36, %v1316_v31  ;;  %1871 = vmatpush3.bf16.msra.mxu0 %v1962_v34 }
 0x157   : > { %v1327_v18 = vsub.f32 %v2377_v29, %v1314_v46  ;;  %v1010_v50 = vpack.c.bf16 %v1999_v47, %v2001_v49 }
 0x158   : > { %v1339_v1 = vmul.f32 1.442695, %v1328_v3  ;;  %1891 = vmatpush3.bf16.msra.mxu1 %v1963_v10 }
 0x159   : > { %v1337_v51 = vmul.f32 1.442695, %v1327_v18  ;;  %v981_v38 = vpop.xlane.xlu1 %980  ;;  %1872 = vmatprep.mubr.bf16.mxu0 %v1010_v50  ;;  %1892 = vmatprep.subr.bf16.mxu1 %v1964_v42 }
 0x15a   : > { %2010 = vpow2.f32 %v1339_v1  ;;  %v991_v9 = vsub.f32 %v2388_v48, %v981_v38  ;;  %v979_v53 = vpop.xlane.xlu0 %978  ;;  %v2003_v44 = vpop.eup %2002 }
 0x15b   : > { %2012 = vpow2.f32 %v1337_v51  ;;  %v990_v36 = vsub.f32 %v2391_v33, %v979_v53 }
 0x15c   : > { %v1004_v29 = vmul.f32 1.442695, %v991_v9  ;;  %1893 = vmatpush3.bf16.msra.mxu1 %v1964_v42 }
 0x15d   : > { %v1002_v45 = vmul.f32 1.442695, %v990_v36  ;;  %1894 = vmatprep.subr.bf16.mxu1 %v1965_v52 }
 0x15e   : > { %v2005_v59 = vpop.eup %2004  ;;  %2014 = vpow2.f32 %v1004_v29  ;;  %v983_v60 = vpop.xlane.xlu0 %982 }
 0x15f   : > { %2016 = vpow2.f32 %v1002_v45  ;;  %v992_v55 = vsub.f32 %v2397_v61, %v983_v60  ;;  %v1011_v63 = vpack.c.bf16 %v2005_v59, %v2003_v44  ;;  %v2007_v23 = vpop.eup %2006 }
 0x160   : > { %1895 = vmatpush3.bf16.msra.mxu1 %v1965_v52 }
 0x161   : > { %1873 = vmatmul.mubr.bf16.vlgmr.msra.gmra.mxu0 %v1011_v63  ;;  %v1006_v48 = vmul.f32 1.442695, %v992_v55 }
 0x162   : > { %v985_v24 = vpop.xlane.xlu1 %984  ;;  %v1318_v14 = vpop.xlane.xlu0 %1317 }
 0x163   : > { %v2009_v5 = vpop.eup %2008  ;;  %v993_v33 = vsub.f32 %v2403_v8, %v985_v24  ;;  %v1329_v58 = vsub.f32 %v2406_v35, %v1318_v14  ;;  %2018 = vpow2.f32 %v1006_v48 }
 0x164   : > { %v1349_v7 = vpack.c.bf16 %v2009_v5, %v2007_v23 }
 0x165   : > { %v1008_v25 = vmul.f32 1.442695, %v993_v33  ;;  %v1341_v30 = vmul.f32 1.442695, %v1329_v58 }
 0x166   : > { %1896 = vmatprep.mubr.bf16.mxu1 %v1349_v7 }
 0x167   : > { %v2011_v32 = vpop.eup %2010  ;;  %2020 = vpow2.f32 %v1008_v25  ;;  %v1320_v61 = vpop.xlane.xlu1 %1319 }
 0x168   : > { %v2013_v26 = vpop.eup %2012  ;;  %v1330_v4 = vsub.f32 %v2412_v62, %v1320_v61  ;;  %2022 = vpow2.f32 %v1341_v30 }
 0x169   : > { %v1350_v43 = vpack.c.bf16 %v2011_v32, %v2013_v26 }
 0x16a   : > { %v1343_v11 = vmul.f32 1.442695, %v1330_v4 }
 0x16b   : > { %v2015_v16 = vpop.eup %2014  ;;  %1897 = vmatmul.mubr.bf16.vlgmr.msra.gmra.mxu1 %v1350_v43  ;;  %v1324_v12 = vpop.xlane.xlu1 %1323 }
 0x16c   : > { %v1322_v8 = vpop.xlane.xlu0 %1321  ;;  %v2017_v15 = vpop.eup %2016  ;;  %2024 = vpow2.f32 %v1343_v11  ;;  %v1332_v35 = vsub.f32 %v2419_v27, %v1324_v12  ;;  %v2106_v27 = vmov 32  }
 0x16d   : > { %v1331_v19 = vsub.f32 %v2416_v13, %v1322_v8  ;;  %v1012_v22 = vpack.c.bf16 %v2015_v16, %v2017_v15  ;;  %1932 = vset.pattern.permute.xlu1 %v2106_v27  ;;  %1933 = vset.pattern.permute.xlu0 %v2106_v27 }
 0x16e   : > { %v1347_v21 = vmul.f32 1.442695, %v1332_v35 }
 0x16f   : > { %v1345_v20 = vmul.f32 1.442695, %v1331_v19  ;;  %1876 = vmatprep.mubr.bf16.mxu0 %v1012_v22 }
 0x170   : > { %2026 = vpow2.f32 %v1347_v21  ;;  %v2019_v62 = vpop.eup %2018 }
 0x171   : > { %2028 = vpow2.f32 %v1345_v20 }
 0x174   : > { %v2021_v56 = vpop.eup %2020 }
 0x175   : > { %v1013_v28 = vpack.c.bf16 %v2021_v56, %v2019_v62  ;;  %v2023_v6 = vpop.eup %2022 }
 0x177   : > { %1877 = vmatmul.mubr.bf16.gmra.mxu0 %v1013_v28 }
 0x179   : > { %v2025_v39 = vpop.eup %2024 }
 0x17a   : > { %v1351_v40 = vpack.c.bf16 %v2025_v39, %v2023_v6 }
 0x17c   : > { %1900 = vmatprep.mubr.bf16.mxu1 %v1351_v40 }
 0x17d   : > { %v2027_v34 = vpop.eup %2026 }
 0x17e   : > { %v2029_v37 = vpop.eup %2028 }
 0x17f   : > { %v1352_v2 = vpack.c.bf16 %v2027_v34, %v2029_v37 }
 0x181   : > { %1901 = vmatmul.mubr.bf16.gmra.mxu1 %v1352_v2 }
 0x1f9   : > { %v2499_v13 = vpop.f32.mrf.mxu0 }
 0x1fa   : > { %2030 = vrcp.f32 %v2499_v13 }
 0x1fb   : > { %v2502_v0 = vpop.f32.mrf.mxu0 }
 0x1fc   : > { %2032 = vrcp.f32 %v2502_v0 }
 0x1fd   : > { %v2513_v57 = vpop.f32.mrf.mxu0 }
 0x1ff   : > { %v2520_v46 = vpop.f32.mrf.mxu0 }
 0x203   : > { %v2505_v10 = vpop.f32.mrf.mxu1 }
 0x204   : > { %2034 = vrcp.f32 %v2505_v10 }
 0x205   : > { %v2508_v41 = vpop.f32.mrf.mxu1 }
 0x206   : > { %2036 = vrcp.f32 %v2508_v41 }
 0x207   : > { %v2031_v54 = vpop.eup %2030  ;;  %v2511_v17 = vpop.f32.mrf.mxu1 }
 0x208   : > { %2038 = vrcp.f32 %v2511_v17  ;;  %518 = vperm.xlu1 %1932, %v2031_v54  }
 0x209   : > { %v2033_v47 = vpop.eup %2032  ;;  %v2516_v31 = vpop.f32.mrf.mxu1  ;;  %2040 = vrcp.f32 %v2513_v57 }
 0x20a   : > { %508 = vperm.xlu0 %1933, %v2033_v47   ;;  %2042 = vrcp.f32 %v2516_v31 }
 0x20b   : > { %2044 = vrcp.f32 %v2520_v46  ;;  %v2523_v49 = vpop.f32.mrf.mxu0 }
 0x20c   : > { %2046 = vrcp.f32 %v2523_v49 }
 0x20d   : > { %v2528_v1 = vpop.f32.mrf.mxu0 }
 0x20f   : > { %v2536_v53 = vpop.f32.mrf.mxu0 }
 0x211   : > { %v2035_v42 = vpop.eup %2034  ;;  %v2542_v44 = vpop.f32.mrf.mxu0 }
 0x212   : > { %825 = vperm.xlu1 %1932, %v2035_v42  }
 0x213   : > { %v2037_v3 = vpop.eup %2036 }
 0x215   : > { %v2039_v18 = vpop.eup %2038  ;;  %v2526_v50 = vpop.f32.mrf.mxu1 }
 0x216   : > { %815 = vperm.xlu1 %1932, %v2037_v3   ;;  %830 = vperm.xlu0 %1933, %v2039_v18   ;;  %v2041_v38 = vpop.eup %2040  ;;  %2048 = vrcp.f32 %v2526_v50 }
 0x217   : > { %v2530_v51 = vpop.f32.mrf.mxu1  ;;  %v2043_v52 = vpop.eup %2042 }
 0x218   : > { %v2045_v29 = vpop.eup %2044 }
 0x219   : > { %v2533_v9 = vpop.f32.mrf.mxu1  ;;  %v2047_v45 = vpop.eup %2046 }
 0x21a   : > { %2050 = vrcp.f32 %v2533_v9  ;;  %523 = vperm.xlu1 %1932, %v2041_v38   ;;  %820 = vperm.xlu0 %1933, %v2043_v52  }
 0x21b   : > { %v2538_v36 = vpop.f32.mrf.mxu1  ;;  %2052 = vrcp.f32 %v2528_v1 }
 0x21c   : > { %2054 = vrcp.f32 %v2538_v36 }
 0x21d   : > { %2056 = vrcp.f32 %v2530_v51 }
 0x21e   : > { %513 = vperm.xlu1 %1932, %v2045_v29   ;;  %2058 = vrcp.f32 %v2536_v53 }
 0x221   : > { %v2545_v59 = vpop.f32.mrf.mxu0 }
 0x222   : > { %538 = vperm.xlu1 %1932, %v2047_v45  }
 0x223   : > { %v2547_v60 = vpop.f32.mrf.mxu0  ;;  %v2049_v55 = vpop.eup %2048 }
 0x225   : > { %v2550_v63 = vpop.f32.mrf.mxu0 }
 0x226   : > { %845 = vperm.xlu1 %1932, %v2049_v55   ;;  %2060 = vrcp.f32 %v2550_v63 }
 0x227   : > { %v2051_v23 = vpop.eup %2050  ;;  %2062 = vrcp.f32 %v2542_v44  ;;  %v2563_v25 = vpop.f32.mrf.mxu0 }
 0x228   : > { %850 = vperm.xlu0 %1933, %v2051_v23   ;;  %v2053_v48 = vpop.eup %2052  ;;  %2064 = vrcp.f32 %v2545_v59 }
 0x229   : > { %v2055_v24 = vpop.eup %2054 }
 0x22a   : > { %528 = vperm.xlu1 %1932, %v2053_v48   ;;  %v2057_v5 = vpop.eup %2056 }
 0x22b   : > { %v2554_v14 = vpop.f32.mrf.mxu1  ;;  %v2059_v7 = vpop.eup %2058 }
 0x22c   : > { %840 = vperm.xlu0 %1933, %v2055_v24   ;;  %2066 = vrcp.f32 %v2554_v14 }
 0x22d   : > { %v2557_v33 = vpop.f32.mrf.mxu1 }
 0x22e   : > { %835 = vperm.xlu1 %1932, %v2057_v5  }
 0x22f   : > { %v2560_v58 = vpop.f32.mrf.mxu1 }
 0x230   : > { %2068 = vrcp.f32 %v2560_v58 }
 0x231   : > { %2070 = vrcp.f32 %v2547_v60  ;;  %v2567_v61 = vpop.f32.mrf.mxu1 }
 0x232   : > { %543 = vperm.xlu1 %1932, %v2059_v7   ;;  %2072 = vrcp.f32 %v2563_v25 }
 0x233   : > { %v2061_v32 = vpop.eup %2060  ;;  %2074 = vrcp.f32 %v2557_v33 }
 0x234   : > { %1169 = vperm.xlu0 %1933, %v2061_v32   ;;  %v2063_v30 = vpop.eup %2062  ;;  %2076 = vrcp.f32 %v2567_v61 }
 0x235   : > { %v2065_v4 = vpop.eup %2064 }
 0x236   : > { %533 = vperm.xlu1 %1932, %v2063_v30  }
 0x237   : > { %v2570_v26 = vpop.f32.mrf.mxu0 }
 0x238   : > { %2078 = vrcp.f32 %v2570_v26 }
 0x239   : > { %v2573_v43 = vpop.f32.mrf.mxu0  ;;  %v2067_v16 = vpop.eup %2066 }
 0x23a   : > { %1164 = vperm.xlu1 %1932, %v2065_v4  }
 0x23b   : > { %v2576_v11 = vpop.f32.mrf.mxu0 }
 0x23c   : > { %2080 = vrcp.f32 %v2576_v11 }
 0x23d   : > { %v2069_v12 = vpop.eup %2068  ;;  %v2579_v8 = vpop.f32.mrf.mxu0  ;;  %2082 = vrcp.f32 %v2573_v43 }
 0x23e   : > { %1503 = vperm.xlu1 %1932, %v2067_v16   ;;  %1508 = vperm.xlu0 %1933, %v2069_v12   ;;  %v2071_v15 = vpop.eup %2070  ;;  %2084 = vrcp.f32 %v2579_v8 }
 0x23f   : > { %v2073_v35 = vpop.eup %2072 }
 0x240   : > { %v2075_v21 = vpop.eup %2074 }
 0x241   : > { %v2583_v19 = vpop.f32.mrf.mxu1  ;;  %v2077_v20 = vpop.eup %2076 }
 0x242   : > { %1154 = vperm.xlu1 %1932, %v2071_v15   ;;  %1159 = vperm.xlu0 %1933, %v2073_v35  }
 0x243   : > { %v2585_v22 = vpop.f32.mrf.mxu1 }
 0x244   : > { %2086 = vrcp.f32 %v2585_v22 }
 0x245   : > { %v2588_v62 = vpop.f32.mrf.mxu1  ;;  %2088 = vrcp.f32 %v2583_v19  ;;  %v2079_v28 = vpop.eup %2078 }
 0x246   : > { %1493 = vperm.xlu1 %1932, %v2075_v21   ;;  %1498 = vperm.xlu0 %1933, %v2077_v20  }
 0x247   : > { %v2591_v56 = vpop.f32.mrf.mxu1 }
 0x248   : > { %2090 = vrcp.f32 %v2591_v56 }
 0x249   : > { %v2081_v6 = vpop.eup %2080  ;;  %2092 = vrcp.f32 %v2588_v62 }
 0x24a   : > { %1184 = vperm.xlu1 %1932, %v2079_v28   ;;  %1189 = vperm.xlu0 %1933, %v2081_v6   ;;  %v2083_v39 = vpop.eup %2082 }
 0x24b   : > { %v2085_v40 = vpop.eup %2084 }
 0x24e   : > { %1174 = vperm.xlu1 %1932, %v2083_v39   ;;  %1179 = vperm.xlu0 %1933, %v2085_v40  }
 0x251   : > { %v2087_v34 = vpop.eup %2086 }
 0x252   : > { %1513 = vperm.xlu1 %1932, %v2087_v34   ;;  %v2089_v37 = vpop.eup %2088 }
 0x255   : > { %v2091_v2 = vpop.eup %2090 }
 0x256   : > { %1523 = vperm.xlu1 %1932, %v2089_v37   ;;  %1518 = vperm.xlu0 %1933, %v2091_v2   ;;  %v2093_v27 = vpop.eup %2092 }
 0x25a   : > { %1528 = vperm.xlu0 %1933, %v2093_v27  }
 0x283   : > { %v519_v54 = vpop.permute.xlu1 %518 }
 0x284   : > { %v548_v47 = vmul.f32 %v2499_v13, %v519_v54 }
 0x285   : > { %v509_v42 = vpop.permute.xlu0 %508 }
 0x286   : > { %557 = vst.msk [vmem:[%s2600_s25 + $0x10] sm:$0xff] %vm554_vm0, %v548_v47  ;;  %v546_v3 = vmul.f32 %v509_v42, %v2502_v0 }
 0x288   : > { %555 = vst.msk [vmem:[%s2600_s25] sm:$0xff] %vm554_vm0, %v546_v3 }
 0x28d   : > { %v826_v18 = vpop.permute.xlu1 %825 }
 0x28e   : > { %v855_v38 = vmul.f32 %v2505_v10, %v826_v18 }
 0x290   : > { %873 = vrot.lane.b32.xlu1 %v855_v38, %s2107_s17 }
 0x291   : > { %v816_v52 = vpop.permute.xlu1 %815  ;;  %v831_v29 = vpop.permute.xlu0 %830 }
 0x292   : > { %v853_v13 = vmul.f32 %v816_v52, %v2508_v41  ;;  %v856_v45 = vmul.f32 %v2511_v17, %v831_v29 }
 0x294   : > { %869 = vrot.lane.b32.xlu1 %v853_v13, %s2107_s17  ;;  %875 = vrot.lane.b32.xlu0 %v856_v45, %s2107_s17 }
 0x295   : > { %v524_v0 = vpop.permute.xlu1 %523  ;;  %v821_v55 = vpop.permute.xlu0 %820 }
 0x296   : > { %v549_v23 = vmul.f32 %v2513_v57, %v524_v0  ;;  %v854_v10 = vmul.f32 %v821_v55, %v2516_v31 }
 0x298   : > { %558 = vst.msk [vmem:[%s2600_s25 + $0x18] sm:$0xff] %vm554_vm0, %v549_v23  ;;  %871 = vrot.lane.b32.xlu0 %v854_v10, %s2107_s17 }
 0x299   : > { %v514_v48 = vpop.permute.xlu1 %513 }
 0x29a   : > { %v547_v41 = vmul.f32 %v514_v48, %v2520_v46 }
 0x29c   : > { %556 = vst.msk [vmem:[%s2600_s25 + $0x8] sm:$0xff] %vm554_vm0, %v547_v41 }
 0x29d   : > { %v539_v17 = vpop.permute.xlu1 %538 }
 0x29e   : > { %v552_v24 = vmul.f32 %v2523_v49, %v539_v17 }
 0x2a0   : > { %561 = vst.msk [vmem:[%s2600_s25 + $0x30] sm:$0xff] %vm554_vm0, %v552_v24 }
 0x2a1   : > { %v846_v5 = vpop.permute.xlu1 %845 }
 0x2a2   : > { %v859_v57 = vmul.f32 %v2526_v50, %v846_v5 }
 0x2a3   : > { %v851_v7 = vpop.permute.xlu0 %850 }
 0x2a4   : > { %v860_v31 = vmul.f32 %v2533_v9, %v851_v7  ;;  %881 = vrot.lane.b32.xlu1 %v859_v57, %s2107_s17 }
 0x2a5   : > { %v529_v32 = vpop.permute.xlu1 %528 }
 0x2a6   : > { %v550_v30 = vmul.f32 %v529_v32, %v2528_v1  ;;  %883 = vrot.lane.b32.xlu0 %v860_v31, %s2107_s17 }
 0x2a7   : > { %v841_v46 = vpop.permute.xlu0 %840 }
 0x2a8   : > { %559 = vst.msk [vmem:[%s2600_s25 + $0x20] sm:$0xff] %vm554_vm0, %v550_v30  ;;  %v858_v49 = vmul.f32 %v841_v46, %v2538_v36 }
 0x2a9   : > { %v836_v4 = vpop.permute.xlu1 %835 }
 0x2aa   : > { %v857_v50 = vmul.f32 %v836_v4, %v2530_v51  ;;  %879 = vrot.lane.b32.xlu0 %v858_v49, %s2107_s17 }
 0x2ac   : > { %877 = vrot.lane.b32.xlu1 %v857_v50, %s2107_s17 }
 0x2ad   : > { %v544_v9 = vpop.permute.xlu1 %543 }
 0x2ae   : > { %v553_v16 = vmul.f32 %v2536_v53, %v544_v9 }
 0x2af   : > { %v1170_v12 = vpop.permute.xlu0 %1169 }
 0x2b0   : > { %562 = vst.msk [vmem:[%s2600_s25 + $0x38] sm:$0xff] %vm554_vm0, %v553_v16  ;;  %v1195_v1 = vmul.f32 %v2550_v63, %v1170_v12 }
 0x2b1   : > { %v534_v15 = vpop.permute.xlu1 %533 }
 0x2b2   : > { %v551_v35 = vmul.f32 %v534_v15, %v2542_v44  ;;  %1214 = vrot.lane.b32.xlu0 %v1195_v1, %s2108_s18 }
 0x2b4   : > { %560 = vst.msk [vmem:[%s2600_s25 + $0x28] sm:$0xff] %vm554_vm0, %v551_v35 }
 0x2b5   : > { %v1165_v51 = vpop.permute.xlu1 %1164 }
 0x2b6   : > { %v1194_v36 = vmul.f32 %v2545_v59, %v1165_v51 }
 0x2b8   : > { %1212 = vrot.lane.b32.xlu1 %v1194_v36, %s2108_s18 }
 0x2b9   : > { %v1504_v21 = vpop.permute.xlu1 %1503  ;;  %v1509_v53 = vpop.permute.xlu0 %1508 }
 0x2ba   : > { %v1533_v20 = vmul.f32 %v2554_v14, %v1504_v21  ;;  %v1534_v28 = vmul.f32 %v2560_v58, %v1509_v53 }
 0x2bc   : > { %1551 = vrot.lane.b32.xlu1 %v1533_v20, %s2109_s26  ;;  %1553 = vrot.lane.b32.xlu0 %v1534_v28, %s2109_s26 }
 0x2bd   : > { %v1155_v44 = vpop.permute.xlu1 %1154  ;;  %v1160_v63 = vpop.permute.xlu0 %1159 }
 0x2be   : > { %v1192_v6 = vmul.f32 %v1155_v44, %v2547_v60  ;;  %v1193_v39 = vmul.f32 %v1160_v63, %v2563_v25 }
 0x2c0   : > { %1208 = vrot.lane.b32.xlu1 %v1192_v6, %s2108_s18  ;;  %1210 = vrot.lane.b32.xlu0 %v1193_v39, %s2108_s18 }
 0x2c1   : > { %v1494_v59 = vpop.permute.xlu1 %1493  ;;  %v1499_v40 = vpop.permute.xlu0 %1498 }
 0x2c2   : > { %v1531_v14 = vmul.f32 %v1494_v59, %v2557_v33  ;;  %v1532_v58 = vmul.f32 %v1499_v40, %v2567_v61 }
 0x2c4   : > { %1547 = vrot.lane.b32.xlu1 %v1531_v14, %s2109_s26  ;;  %1549 = vrot.lane.b32.xlu0 %v1532_v58, %s2109_s26 }
 0x2c5   : > { %v1185_v34 = vpop.permute.xlu1 %1184  ;;  %v1190_v37 = vpop.permute.xlu0 %1189 }
 0x2c6   : > { %v1198_v60 = vmul.f32 %v2570_v26, %v1185_v34  ;;  %v1199_v25 = vmul.f32 %v2576_v11, %v1190_v37 }
 0x2c8   : > { %1220 = vrot.lane.b32.xlu1 %v1198_v60, %s2108_s18  ;;  %1222 = vrot.lane.b32.xlu0 %v1199_v25, %s2108_s18 }
 0x2c9   : > { %v1175_v2 = vpop.permute.xlu1 %1174  ;;  %v1180_v27 = vpop.permute.xlu0 %1179 }
 0x2ca   : > { %v1196_v33 = vmul.f32 %v1175_v2, %v2573_v43  ;;  %v1197_v61 = vmul.f32 %v1180_v27, %v2579_v8 }
 0x2cc   : > { %1216 = vrot.lane.b32.xlu1 %v1196_v33, %s2108_s18  ;;  %1218 = vrot.lane.b32.xlu0 %v1197_v61, %s2108_s18 }
 0x2cd   : > { %v1514_v54 = vpop.permute.xlu1 %1513 }
 0x2ce   : > { %v1535_v26 = vmul.f32 %v1514_v54, %v2585_v22 }
 0x2d0   : > { %1555 = vrot.lane.b32.xlu1 %v1535_v26, %s2109_s26 }
 0x2d1   : > { %v1524_v11 = vpop.permute.xlu1 %1523  ;;  %v1519_v47 = vpop.permute.xlu0 %1518 }
 0x2d2   : > { %v1537_v42 = vmul.f32 %v2583_v19, %v1524_v11  ;;  %v1536_v43 = vmul.f32 %v1519_v47, %v2591_v56 }
 0x2d4   : > { %1559 = vrot.lane.b32.xlu1 %v1537_v42, %s2109_s26  ;;  %1557 = vrot.lane.b32.xlu0 %v1536_v43, %s2109_s26 }
 0x2d5   : > { %v1529_v8 = vpop.permute.xlu0 %1528 }
 0x2d6   : > { %v1538_v22 = vmul.f32 %v2588_v62, %v1529_v8 }
 0x2d8   : > { %1561 = vrot.lane.b32.xlu0 %v1538_v22, %s2109_s26 }
 0x302   : > { %v874_v3 = vpop.permute.xlu1 %873 }
 0x303   : > { %896 = vst.msk [vmem:[%s2600_s25 + $0x10] sm:$0xff] %vm893_vm1, %v874_v3 }
 0x306   : > { %v870_v19 = vpop.permute.xlu1 %869  ;;  %v876_v56 = vpop.permute.xlu0 %875 }
 0x307   : > { %894 = vst.msk [vmem:[%s2600_s25] sm:$0xff] %vm893_vm1, %v870_v19  ;;  %897 = vst.msk [vmem:[%s2600_s25 + $0x18] sm:$0xff] %vm893_vm1, %v876_v56 }
 0x30a   : > { %v872_v18 = vpop.permute.xlu0 %871 }
 0x30b   : > { %895 = vst.msk [vmem:[%s2600_s25 + $0x8] sm:$0xff] %vm893_vm1, %v872_v18 }
 0x316   : > { %v882_v62 = vpop.permute.xlu1 %881 }
 0x317   : > { %900 = vst.msk [vmem:[%s2600_s25 + $0x30] sm:$0xff] %vm893_vm1, %v882_v62 }
 0x318   : > { %v884_v38 = vpop.permute.xlu0 %883 }
 0x319   : > { %901 = vst.msk [vmem:[%s2600_s25 + $0x38] sm:$0xff] %vm893_vm1, %v884_v38 }
 0x31c   : > { %v880_v52 = vpop.permute.xlu0 %879 }
 0x31d   : > { %899 = vst.msk [vmem:[%s2600_s25 + $0x28] sm:$0xff] %vm893_vm1, %v880_v52 }
 0x31e   : > { %v878_v29 = vpop.permute.xlu1 %877 }
 0x31f   : > { %898 = vst.msk [vmem:[%s2600_s25 + $0x20] sm:$0xff] %vm893_vm1, %v878_v29 }
 0x324   : > { %v1215_v13 = vpop.permute.xlu0 %1214 }
 0x325   : > { %1236 = vst.msk [vmem:[%s2600_s25 + $0x18] sm:$0xff] %vm1232_vm2, %v1215_v13 }
 0x32a   : > { %v1213_v45 = vpop.permute.xlu1 %1212 }
 0x32b   : > { %1235 = vst.msk [vmem:[%s2600_s25 + $0x10] sm:$0xff] %vm1232_vm2, %v1213_v45 }
 0x32e   : > { %v1552_v0 = vpop.permute.xlu1 %1551  ;;  %v1554_v55 = vpop.permute.xlu0 %1553 }
 0x32f   : > { %1574 = vst.msk [vmem:[%s2600_s25 + $0x10] sm:$0xff] %vm1571_vm3, %v1552_v0  ;;  %1575 = vst.msk [vmem:[%s2600_s25 + $0x18] sm:$0xff] %vm1571_vm3, %v1554_v55 }
 0x332   : > { %v1209_v23 = vpop.permute.xlu1 %1208  ;;  %v1211_v10 = vpop.permute.xlu0 %1210 }
 0x333   : > { %1233 = vst.msk [vmem:[%s2600_s25] sm:$0xff] %vm1232_vm2, %v1209_v23  ;;  %1234 = vst.msk [vmem:[%s2600_s25 + $0x8] sm:$0xff] %vm1232_vm2, %v1211_v10 }
 0x336   : > { %v1548_v48 = vpop.permute.xlu1 %1547  ;;  %v1550_v41 = vpop.permute.xlu0 %1549 }
 0x337   : > { %1572 = vst.msk [vmem:[%s2600_s25] sm:$0xff] %vm1571_vm3, %v1548_v48  ;;  %1573 = vst.msk [vmem:[%s2600_s25 + $0x8] sm:$0xff] %vm1571_vm3, %v1550_v41 }
 0x33a   : > { %v1221_v17 = vpop.permute.xlu1 %1220  ;;  %v1223_v24 = vpop.permute.xlu0 %1222 }
 0x33b   : > { %1239 = vst.msk [vmem:[%s2600_s25 + $0x30] sm:$0xff] %vm1232_vm2, %v1221_v17  ;;  %1240 = vst.msk [vmem:[%s2600_s25 + $0x38] sm:$0xff] %vm1232_vm2, %v1223_v24 }
 0x33e   : > { %v1217_v5 = vpop.permute.xlu1 %1216  ;;  %v1219_v57 = vpop.permute.xlu0 %1218 }
 0x33f   : > { %1237 = vst.msk [vmem:[%s2600_s25 + $0x20] sm:$0xff] %vm1232_vm2, %v1217_v5  ;;  %1238 = vst.msk [vmem:[%s2600_s25 + $0x28] sm:$0xff] %vm1232_vm2, %v1219_v57 }
 0x342   : > { %v1556_v7 = vpop.permute.xlu1 %1555 }
 0x343   : > { %1576 = vst.msk [vmem:[%s2600_s25 + $0x20] sm:$0xff] %vm1571_vm3, %v1556_v7 }
 0x346   : > { %v1560_v31 = vpop.permute.xlu1 %1559  ;;  %v1558_v32 = vpop.permute.xlu0 %1557 }
 0x347   : > { %1578 = vst.msk [vmem:[%s2600_s25 + $0x30] sm:$0xff] %vm1571_vm3, %v1560_v31  ;;  %1577 = vst.msk [vmem:[%s2600_s25 + $0x28] sm:$0xff] %vm1571_vm3, %v1558_v32 }
 0x34a   : > { %v1562_v30 = vpop.permute.xlu0 %1561 }
 0x34b   : > { %1579 = vst.msk [vmem:[%s2600_s25 + $0x38] sm:$0xff] %vm1571_vm3, %v1562_v30 }
 0x34c PF: > { %s14_s15 = sadd.s32 1, %s2100_s15  }
 0x34d   : > { %p11_p4 = scmp.ge.s32.totalorder %s14_s15, 4  }
 0x34f   :  { %13 = sbr.rel (!%p11_p4) target bundleno = 1 (0x1), region = 72 }

</bundles_post_ra>
